<compile_context>
chip_gen: v7x
topology: tpu7x:2x2x1
jax: 0.10.0
libtpu: 0.0.40
codegen_flags: <defaults>
</compile_context>

<pallas_src>
import functools

import jax
import jax.numpy as jnp
from jax import lax
from jax.experimental import pallas as pl
from jax.experimental.pallas import tpu as pltpu

LN_EPS = 1e-5


def _elu(z):
    # ELU(alpha=1): z if z > 0 else exp(z) - 1.
    return jnp.where(z > 0, z, jnp.exp(jnp.minimum(z, 0.0)) - 1.0)


def critic_mlp_kernel(num_hidden, x_ref, *refs):
    """Fused critic MLP for one batch tile, entirely in VMEM.

    refs = [W_0, P_0, ..., W_{H-2}, P_{H-2}, W_last, b_last, S_last, c_last, o_ref]
      W_i    : (d_in, d_out) bf16   hidden weight, pre-transposed (in-major)
      P_i    : (3, d_out)    f32    rows = [bias, ln_gamma, ln_beta]
      W_last : (d_in, d_h)   bf16   last hidden weight
      b_last : (1, d_h)      f32    last hidden bias
      S_last : (2, d_h)      bf16   rows = [1/d_h, g' = wf * ln_gamma]
      c_last : (1, 2)        f32    [sum(g'), c' = sum(wf * ln_beta) + bf]
      o_ref  : (1, bt)       f32    lane-dense value row for this tile
    """
    o_ref = refs[-1]
    params = refs[:-1]

    h = x_ref[...].astype(jnp.bfloat16)                     # (bt, D)
    for i in range(num_hidden - 1):
        w = params[2 * i][...]                              # (d_in, d_out) bf16
        p = params[2 * i + 1][...]                          # (3, d_out)    f32
        z = jnp.dot(h, w, preferred_element_type=jnp.float32) + p[0:1, :]
        a = _elu(z)
        mu = jnp.mean(a, axis=-1, keepdims=True)
        var = jnp.mean(a * a, axis=-1, keepdims=True) - mu * mu
        hn = (a - mu) * lax.rsqrt(var + LN_EPS) * p[1:2, :] + p[2:3, :]
        h = hn.astype(jnp.bfloat16)

    # Last hidden layer with the (1, d_h) output linear fused into its LayerNorm.
    base = 2 * (num_hidden - 1)
    w_last = params[base][...]                              # (d_in, d_h) bf16
    b_last = params[base + 1][...]                          # (1, d_h)    f32
    s_last = params[base + 2][...]                          # (2, d_h)    bf16
    c_last = params[base + 3][...]                          # (1, 2)      f32

    z = jnp.dot(h, w_last, preferred_element_type=jnp.float32) + b_last
    a = _elu(z)                                             # (bt, d_h) f32
    ab = a.astype(jnp.bfloat16)
    a2b = (a * a).astype(jnp.bfloat16)

    # NT contractions over d_h -> lane-dense rows:
    #   mg[0] = mean(a), mg[1] = <g', a>, sq = E[a^2]   (all shaped (1, bt))
    nt = (((1,), (1,)), ((), ()))
    mg = lax.dot_general(s_last, ab, nt, preferred_element_type=jnp.float32)          # (2, bt)
    sq = lax.dot_general(s_last[0:1, :], a2b, nt, preferred_element_type=jnp.float32)  # (1, bt)
    mu = mg[0:1, :]
    g = mg[1:2, :]
    var = sq - mu * mu
    val = lax.rsqrt(var + LN_EPS) * (g - mu * c_last[0:1, 0:1]) + c_last[0:1, 1:2]
    o_ref[...] = val.astype(o_ref.dtype)


def _tensorcores_per_chip():
    try:
        kind = str(jax.devices()[0].device_kind).lower()
    except Exception:
        return 1
    return 2 if "v7" in kind else 1


def _round_up(n, m):
    return ((n + m - 1) // m) * m


def critic_mlp_forward(x, flat_params, num_hidden, *, num_cores=None,
                       max_batch_tile=4096):
    """x: [B, D_obs] float32.  Returns [B, 1] float32."""
    B, D = x.shape
    assert num_hidden >= 1, "kernel expects at least one hidden layer"
    if num_cores is None:
        num_cores = _tensorcores_per_chip()
    num_cores = max(int(num_cores), 1)

    # Tile selection:
    #  * single-TC chips (v5e/v6e): one full-array block (any B, no padding),
    #  * dual-TC v7x: split into 128-aligned tiles so both cores get work,
    #  * cap the tile so a huge B still pipelines through VMEM comfortably.
    if num_cores == 1 and B <= max_batch_tile:
        bt = B
    else:
        per_core = pl.cdiv(B, num_cores)
        bt = min(_round_up(per_core, 128), _round_up(max_batch_tile, 128))
        if bt >= B:
            bt = B
    num_tiles = pl.cdiv(B, bt)

    in_specs = [pl.BlockSpec((bt, D), lambda i: (i, 0))]
    for p in flat_params:  # parameters: full-array blocks, same block every step
        in_specs.append(pl.BlockSpec(p.shape, lambda i: (0, 0)))
    out_spec = pl.BlockSpec((1, bt), lambda i: (0, i))       # lane-dense row

    kernel = functools.partial(critic_mlp_kernel, num_hidden)
    out_row = pl.pallas_call(
        kernel,
        out_shape=jax.ShapeDtypeStruct((1, B), jnp.float32),
        grid_spec=pltpu.PrefetchScalarGridSpec(
            num_scalar_prefetch=0,
            grid=(num_tiles,),
            in_specs=in_specs,
            out_specs=out_spec,
        ),
        compiler_params=pltpu.CompilerParams(
            dimension_semantics=("parallel",)),
    )(x, *flat_params)

    return out_row.reshape(B, 1)


# ---------------------------------------------------------------------------
# Parameter init (orthogonal, gain=sqrt(2); biases 0; LayerNorm weight=1,
# bias=0) mirroring model_utils.init in the PyTorch code, plus packing into
# the kernel's fused layout.
# ---------------------------------------------------------------------------
def orthogonal_init(key, shape, gain):
    out_dim, in_dim = shape
    a = jax.random.normal(key, (max(out_dim, in_dim), min(out_dim, in_dim)),
                          dtype=jnp.float32)
    q, r = jnp.linalg.qr(a)
    q = q * jnp.sign(jnp.diagonal(r))            # deterministic / unique
    if out_dim < in_dim:
        q = q.T
    return gain * q[:out_dim, :in_dim]


def init_critic_raw_params(key, layer_dims):
    """Per-layer raw (PyTorch-layout) params: hidden -> (W, b, gamma, beta),
    final -> (W, b)."""
    gain = 2.0 ** 0.5
    num_layers = len(layer_dims) - 1
    keys = jax.random.split(key, num_layers)
    raw = []
    for i in range(num_layers):
        d_in, d_out = layer_dims[i], layer_dims[i + 1]
        w = orthogonal_init(keys[i], (d_out, d_in), gain)    # (out, in)
        b = jnp.zeros((d_out,), jnp.float32)
        if i < num_layers - 1:
            raw.append((w, b,
                        jnp.ones((d_out,), jnp.float32),     # LN gamma
                        jnp.zeros((d_out,), jnp.float32)))   # LN beta
        else:
            raw.append((w, b))
    return raw


def pack_critic_params(raw):
    """Raw params -> flat kernel list, folding the final (1, d_h) linear into
    the last LayerNorm: g' = wf*gamma_last, c' = sum(wf*beta_last) + bf."""
    num_hidden = len(raw) - 1
    assert num_hidden >= 1
    flat = []
    for i in range(num_hidden - 1):
        w, b, gamma, beta = raw[i]
        flat.append(w.T.astype(jnp.bfloat16))                        # (in, out)
        flat.append(jnp.stack([b, gamma, beta]).astype(jnp.float32))  # (3, out)
    w, b, gamma, beta = raw[num_hidden - 1]
    wf, bf = raw[num_hidden]                                          # (1, d_h), (1,)
    d_h = w.shape[0]
    gprime = (wf[0] * gamma).astype(jnp.float32)                      # (d_h,)
    sum_g = jnp.sum(gprime)
    cprime = jnp.sum(wf[0] * beta) + bf[0]
    flat.append(w.T.astype(jnp.bfloat16))                             # (in, d_h)
    flat.append(b.reshape(1, d_h).astype(jnp.float32))                # (1, d_h)
    flat.append(jnp.stack([jnp.full((d_h,), 1.0 / d_h, jnp.float32),
                           gprime]).astype(jnp.bfloat16))             # (2, d_h)
    flat.append(jnp.stack([sum_g, cprime]).reshape(1, 2).astype(jnp.float32))
    return flat, num_hidden


# ---------------------------------------------------------------------------
# References
# ---------------------------------------------------------------------------
def critic_ref_f32(x, raw):
    """Module-faithful forward: f32, HIGHEST-precision matmuls, two-pass LN."""
    h = x
    num_hidden = len(raw) - 1
    for i in range(num_hidden):
        w, b, gamma, beta = raw[i]
        z = jnp.dot(h, w.T, precision=lax.Precision.HIGHEST) + b
        a = _elu(z)
        mu = jnp.mean(a, axis=-1, keepdims=True)
        var = jnp.mean((a - mu) ** 2, axis=-1, keepdims=True)
        h = (a - mu) / jnp.sqrt(var + LN_EPS) * gamma + beta
    wf, bf = raw[num_hidden]
    return jnp.dot(h, wf.T, precision=lax.Precision.HIGHEST) + bf     # (B, 1)


def critic_ref_packed(x, flat_params, num_hidden):
    """Pure-JAX replica of the kernel's exact math (bf16 matmuls, one-pass
    variance, fused final layer) for a tight numerical check."""
    h = x.astype(jnp.bfloat16)
    for i in range(num_hidden - 1):
        w = flat_params[2 * i]
        p = flat_params[2 * i + 1]
        z = jnp.dot(h, w, preferred_element_type=jnp.float32) + p[0:1, :]
        a = _elu(z)
        mu = jnp.mean(a, axis=-1, keepdims=True)
        var = jnp.mean(a * a, axis=-1, keepdims=True) - mu * mu
        h = ((a - mu) * lax.rsqrt(var + LN_EPS) * p[1:2, :] + p[2:3, :]).astype(jnp.bfloat16)
    base = 2 * (num_hidden - 1)
    w_last, b_last, s_last, c_last = flat_params[base:base + 4]
    z = jnp.dot(h, w_last, preferred_element_type=jnp.float32) + b_last
    a = _elu(z)
    ab = a.astype(jnp.bfloat16)
    a2b = (a * a).astype(jnp.bfloat16)
    nt = (((1,), (1,)), ((), ()))
    mg = lax.dot_general(s_last, ab, nt, preferred_element_type=jnp.float32)
    sq = lax.dot_general(s_last[0:1, :], a2b, nt, preferred_element_type=jnp.float32)
    mu, g = mg[0:1, :], mg[1:2, :]
    var = sq - mu * mu
    val = lax.rsqrt(var + LN_EPS) * (g - mu * c_last[0, 0]) + c_last[0, 1]
    return val.reshape(-1, 1)                                          # (B, 1)


if __name__ == "__main__":
    # Config consistent with the module: privilege_obs_dim=32,
    # cfg_network['critic_mlp'] = {'units': [64, 64], 'activation': 'elu'}.
    privilege_obs_dim = 32
    units = [64, 64]
    layer_dims = [privilege_obs_dim] + units + [1]

    # B deliberately not 8/128-aligned: exercises the full-block path and
    # (when forced to 2 tiles) the partial tail-block path.
    batch = 300

    key = jax.random.PRNGKey(0)
    k_obs, k_params = jax.random.split(key)
    obs = jax.random.normal(k_obs, (batch, privilege_obs_dim), dtype=jnp.float32)

    raw = init_critic_raw_params(k_params, layer_dims)
    flat_params, num_hidden = pack_critic_params(raw)

    ref_tight = critic_ref_packed(obs, flat_params, num_hidden)   # kernel numerics
    ref_f32 = critic_ref_f32(obs, raw)                            # module-faithful f32

    # 1) auto tiling (one full block on single-TC chips, 2 tiles on v7x).
    values = critic_mlp_forward(obs, flat_params, num_hidden)
    values = jax.block_until_ready(values)
    assert values.shape == (batch, 1)
    assert jnp.allclose(values, ref_tight, atol=5e-3, rtol=5e-3), (
        "auto-tiled kernel mismatch vs matched-numerics reference")
    # bf16 matmul path trades a little accuracy vs the f32 module; loose check.
    assert jnp.allclose(values, ref_f32, atol=1e-1, rtol=5e-2), (
        "auto-tiled kernel mismatch vs f32 reference")

    # 2) forced 2-tile grid (v7x-style split; exercises the masked partial tail).
    values2 = critic_mlp_forward(obs, flat_params, num_hidden, num_cores=2)
    values2 = jax.block_until_ready(values2)
    assert values2.shape == (batch, 1)
    assert jnp.allclose(values2, ref_tight, atol=5e-3, rtol=5e-3), (
        "2-tile kernel mismatch vs matched-numerics reference")

    print("KERNEL_OK")
</pallas_src>

<mosaic_0001>
module attributes {stable_mosaic.version = 11 : i64} {
  func.func @critic_mlp_kernel(%arg0: i32, %arg1: memref<300x32xf32, #tpu.memory_space<vmem>>, %arg2: memref<32x64xbf16, #tpu.memory_space<vmem>>, %arg3: memref<3x64xf32, #tpu.memory_space<vmem>>, %arg4: memref<64x64xbf16, #tpu.memory_space<vmem>>, %arg5: memref<1x64xf32, #tpu.memory_space<vmem>>, %arg6: memref<2x64xbf16, #tpu.memory_space<vmem>>, %arg7: memref<1x2xf32, #tpu.memory_space<vmem>>, %arg8: memref<1x300xf32, #tpu.memory_space<vmem>>) attributes {dimension_semantics = [#tpu.dimension_semantics<parallel>], iteration_bounds = array<i64: 1>, scalar_prefetch = 0 : i64, scratch_operands = 0 : i64, tpu.core_type = #tpu.core_type<tc>, window_params = [{transform_indices = @transform_0, window_bounds = array<i64: 300, 32>}, {pipeline_mode = #tpu.pipeline_mode<synchronous>, transform_indices = @transform_1, window_bounds = array<i64: 32, 64>}, {pipeline_mode = #tpu.pipeline_mode<synchronous>, transform_indices = @transform_2, window_bounds = array<i64: 3, 64>}, {pipeline_mode = #tpu.pipeline_mode<synchronous>, transform_indices = @transform_3, window_bounds = array<i64: 64, 64>}, {pipeline_mode = #tpu.pipeline_mode<synchronous>, transform_indices = @transform_4, window_bounds = array<i64: 1, 64>}, {pipeline_mode = #tpu.pipeline_mode<synchronous>, transform_indices = @transform_5, window_bounds = array<i64: 2, 64>}, {pipeline_mode = #tpu.pipeline_mode<synchronous>, transform_indices = @transform_6, window_bounds = array<i64: 1, 2>}, {transform_indices = @transform_7, window_bounds = array<i64: 1, 300>}]} {
    %c0 = arith.constant 0 : index
    %c0_0 = arith.constant 0 : index
    %0 = vector.load %arg1[%c0, %c0_0] : memref<300x32xf32, #tpu.memory_space<vmem>>, vector<300x32xf32>
    %1 = arith.truncf %0 : vector<300x32xf32> to vector<300x32xbf16>
    %c0_1 = arith.constant 0 : index
    %c0_2 = arith.constant 0 : index
    %2 = vector.load %arg2[%c0_1, %c0_2] : memref<32x64xbf16, #tpu.memory_space<vmem>>, vector<32x64xbf16>
    %c0_3 = arith.constant 0 : index
    %c0_4 = arith.constant 0 : index
    %3 = vector.load %arg3[%c0_3, %c0_4] : memref<3x64xf32, #tpu.memory_space<vmem>>, vector<3x64xf32>
    %cst = arith.constant dense<0.000000e+00> : vector<300x64xf32>
    %4 = tpu.matmul %1, %2, %cst {dimension_numbers = #tpu.dot_dimension_numbers<[1], [0], [0], [1], [0, 0, 1, 1], [], []>} : vector<300x32xbf16>, vector<32x64xbf16>, vector<300x64xf32> -> vector<300x64xf32>
    %5 = vector.extract_strided_slice %3 {offsets = [0, 0], sizes = [1, 64], strides = [1, 1]} : vector<3x64xf32> to vector<1x64xf32>
    %6 = vector.broadcast %5 : vector<1x64xf32> to vector<300x64xf32>
    %7 = arith.addf %4, %6 : vector<300x64xf32>
    %cst_5 = arith.constant 0.000000e+00 : f32
    %8 = vector.broadcast %cst_5 : f32 to vector<300x64xf32>
    %9 = arith.cmpf ogt, %7, %8 : vector<300x64xf32>
    %cst_6 = arith.constant 0.000000e+00 : f32
    %10 = vector.broadcast %cst_6 : f32 to vector<300x64xf32>
    %11 = arith.minimumf %7, %10 : vector<300x64xf32>
    %12 = math.exp %11 : vector<300x64xf32>
    %cst_7 = arith.constant 1.000000e+00 : f32
    %13 = vector.broadcast %cst_7 : f32 to vector<300x64xf32>
    %14 = arith.subf %12, %13 : vector<300x64xf32>
    %15 = arith.select %9, %7, %14 : vector<300x64xi1>, vector<300x64xf32>
    %cst_8 = arith.constant dense<0.000000e+00> : vector<300xf32>
    %16 = vector.multi_reduction <add>, %15, %cst_8 [1] : vector<300x64xf32> to vector<300xf32>
    %17 = vector.shape_cast %16 : vector<300xf32> to vector<300x1xf32>
    %cst_9 = arith.constant 6.400000e+01 : f32
    %18 = vector.broadcast %cst_9 : f32 to vector<300x1xf32>
    %19 = arith.divf %17, %18 : vector<300x1xf32>
    %20 = arith.mulf %15, %15 : vector<300x64xf32>
    %cst_10 = arith.constant dense<0.000000e+00> : vector<300xf32>
    %21 = vector.multi_reduction <add>, %20, %cst_10 [1] : vector<300x64xf32> to vector<300xf32>
    %22 = vector.shape_cast %21 : vector<300xf32> to vector<300x1xf32>
    %cst_11 = arith.constant 6.400000e+01 : f32
    %23 = vector.broadcast %cst_11 : f32 to vector<300x1xf32>
    %24 = arith.divf %22, %23 : vector<300x1xf32>
    %25 = arith.mulf %19, %19 : vector<300x1xf32>
    %26 = arith.subf %24, %25 : vector<300x1xf32>
    %27 = vector.broadcast %19 : vector<300x1xf32> to vector<300x64xf32>
    %28 = arith.subf %15, %27 : vector<300x64xf32>
    %cst_12 = arith.constant 9.99999974E-6 : f32
    %29 = vector.broadcast %cst_12 : f32 to vector<300x1xf32>
    %30 = arith.addf %26, %29 : vector<300x1xf32>
    %31 = math.rsqrt %30 : vector<300x1xf32>
    %32 = vector.broadcast %31 : vector<300x1xf32> to vector<300x64xf32>
    %33 = arith.mulf %28, %32 : vector<300x64xf32>
    %34 = vector.extract_strided_slice %3 {offsets = [1, 0], sizes = [1, 64], strides = [1, 1]} : vector<3x64xf32> to vector<1x64xf32>
    %35 = vector.broadcast %34 : vector<1x64xf32> to vector<300x64xf32>
    %36 = arith.mulf %33, %35 : vector<300x64xf32>
    %37 = vector.extract_strided_slice %3 {offsets = [2, 0], sizes = [1, 64], strides = [1, 1]} : vector<3x64xf32> to vector<1x64xf32>
    %38 = vector.broadcast %37 : vector<1x64xf32> to vector<300x64xf32>
    %39 = arith.addf %36, %38 : vector<300x64xf32>
    %40 = arith.truncf %39 : vector<300x64xf32> to vector<300x64xbf16>
    %c0_13 = arith.constant 0 : index
    %c0_14 = arith.constant 0 : index
    %41 = vector.load %arg4[%c0_13, %c0_14] : memref<64x64xbf16, #tpu.memory_space<vmem>>, vector<64x64xbf16>
    %c0_15 = arith.constant 0 : index
    %c0_16 = arith.constant 0 : index
    %42 = vector.load %arg5[%c0_15, %c0_16] : memref<1x64xf32, #tpu.memory_space<vmem>>, vector<1x64xf32>
    %c0_17 = arith.constant 0 : index
    %c0_18 = arith.constant 0 : index
    %43 = vector.load %arg6[%c0_17, %c0_18] : memref<2x64xbf16, #tpu.memory_space<vmem>>, vector<2x64xbf16>
    %c0_19 = arith.constant 0 : index
    %c0_20 = arith.constant 0 : index
    %44 = vector.load %arg7[%c0_19, %c0_20] : memref<1x2xf32, #tpu.memory_space<vmem>>, vector<1x2xf32>
    %cst_21 = arith.constant dense<0.000000e+00> : vector<300x64xf32>
    %45 = tpu.matmul %40, %41, %cst_21 {dimension_numbers = #tpu.dot_dimension_numbers<[1], [0], [0], [1], [0, 0, 1, 1], [], []>} : vector<300x64xbf16>, vector<64x64xbf16>, vector<300x64xf32> -> vector<300x64xf32>
    %46 = vector.broadcast %42 : vector<1x64xf32> to vector<300x64xf32>
    %47 = arith.addf %45, %46 : vector<300x64xf32>
    %cst_22 = arith.constant 0.000000e+00 : f32
    %48 = vector.broadcast %cst_22 : f32 to vector<300x64xf32>
    %49 = arith.cmpf ogt, %47, %48 : vector<300x64xf32>
    %cst_23 = arith.constant 0.000000e+00 : f32
    %50 = vector.broadcast %cst_23 : f32 to vector<300x64xf32>
    %51 = arith.minimumf %47, %50 : vector<300x64xf32>
    %52 = math.exp %51 : vector<300x64xf32>
    %cst_24 = arith.constant 1.000000e+00 : f32
    %53 = vector.broadcast %cst_24 : f32 to vector<300x64xf32>
    %54 = arith.subf %52, %53 : vector<300x64xf32>
    %55 = arith.select %49, %47, %54 : vector<300x64xi1>, vector<300x64xf32>
    %56 = arith.truncf %55 : vector<300x64xf32> to vector<300x64xbf16>
    %57 = arith.mulf %55, %55 : vector<300x64xf32>
    %58 = arith.truncf %57 : vector<300x64xf32> to vector<300x64xbf16>
    %cst_25 = arith.constant dense<0.000000e+00> : vector<2x300xf32>
    %59 = tpu.matmul %43, %56, %cst_25 {dimension_numbers = #tpu.dot_dimension_numbers<[1], [1], [0], [0], [0, 0, 1, 0], [], []>} : vector<2x64xbf16>, vector<300x64xbf16>, vector<2x300xf32> -> vector<2x300xf32>
    %60 = vector.extract_strided_slice %43 {offsets = [0, 0], sizes = [1, 64], strides = [1, 1]} : vector<2x64xbf16> to vector<1x64xbf16>
    %cst_26 = arith.constant dense<0.000000e+00> : vector<1x300xf32>
    %61 = tpu.matmul %60, %58, %cst_26 {dimension_numbers = #tpu.dot_dimension_numbers<[1], [1], [0], [0], [0, 0, 1, 0], [], []>} : vector<1x64xbf16>, vector<300x64xbf16>, vector<1x300xf32> -> vector<1x300xf32>
    %62 = vector.extract_strided_slice %59 {offsets = [0, 0], sizes = [1, 300], strides = [1, 1]} : vector<2x300xf32> to vector<1x300xf32>
    %63 = vector.extract_strided_slice %59 {offsets = [1, 0], sizes = [1, 300], strides = [1, 1]} : vector<2x300xf32> to vector<1x300xf32>
    %64 = arith.mulf %62, %62 : vector<1x300xf32>
    %65 = arith.subf %61, %64 : vector<1x300xf32>
    %cst_27 = arith.constant 9.99999974E-6 : f32
    %66 = vector.broadcast %cst_27 : f32 to vector<1x300xf32>
    %67 = arith.addf %65, %66 : vector<1x300xf32>
    %68 = math.rsqrt %67 : vector<1x300xf32>
    %69 = vector.extract_strided_slice %44 {offsets = [0, 0], sizes = [1, 1], strides = [1, 1]} : vector<1x2xf32> to vector<1x1xf32>
    %70 = vector.broadcast %69 : vector<1x1xf32> to vector<1x300xf32>
    %71 = arith.mulf %62, %70 : vector<1x300xf32>
    %72 = arith.subf %63, %71 : vector<1x300xf32>
    %73 = arith.mulf %68, %72 : vector<1x300xf32>
    %74 = vector.extract_strided_slice %44 {offsets = [0, 1], sizes = [1, 1], strides = [1, 1]} : vector<1x2xf32> to vector<1x1xf32>
    %75 = vector.broadcast %74 : vector<1x1xf32> to vector<1x300xf32>
    %76 = arith.addf %73, %75 : vector<1x300xf32>
    %c0_28 = arith.constant 0 : index
    %c0_29 = arith.constant 0 : index
    %77 = vector.load %arg8[%c0_28, %c0_29] : memref<1x300xf32, #tpu.memory_space<vmem>>, vector<1x300xf32>
    tpu.vector_store %arg8[%c0_28, %c0_29], %76 {strides = array<i32>} : memref<1x300xf32, #tpu.memory_space<vmem>>, vector<1x300xf32>,
    return
  }
  func.func @transform_0(%arg0: i32) -> (i32, i32) {
    %c0_i32 = arith.constant 0 : i32
    %c0_i32_0 = arith.constant 0 : i32
    return %arg0, %c0_i32 : i32, i32
  }
  func.func @transform_1(%arg0: i32) -> (i32, i32) {
    %c0_i32 = arith.constant 0 : i32
    %c0_i32_0 = arith.constant 0 : i32
    %c0_i32_1 = arith.constant 0 : i32
    return %c0_i32, %c0_i32_0 : i32, i32
  }
  func.func @transform_2(%arg0: i32) -> (i32, i32) {
    %c0_i32 = arith.constant 0 : i32
    %c0_i32_0 = arith.constant 0 : i32
    %c0_i32_1 = arith.constant 0 : i32
    return %c0_i32, %c0_i32_0 : i32, i32
  }
  func.func @transform_3(%arg0: i32) -> (i32, i32) {
    %c0_i32 = arith.constant 0 : i32
    %c0_i32_0 = arith.constant 0 : i32
    %c0_i32_1 = arith.constant 0 : i32
    return %c0_i32, %c0_i32_0 : i32, i32
  }
  func.func @transform_4(%arg0: i32) -> (i32, i32) {
    %c0_i32 = arith.constant 0 : i32
    %c0_i32_0 = arith.constant 0 : i32
    %c0_i32_1 = arith.constant 0 : i32
    return %c0_i32, %c0_i32_0 : i32, i32
  }
  func.func @transform_5(%arg0: i32) -> (i32, i32) {
    %c0_i32 = arith.constant 0 : i32
    %c0_i32_0 = arith.constant 0 : i32
    %c0_i32_1 = arith.constant 0 : i32
    return %c0_i32, %c0_i32_0 : i32, i32
  }
  func.func @transform_6(%arg0: i32) -> (i32, i32) {
    %c0_i32 = arith.constant 0 : i32
    %c0_i32_0 = arith.constant 0 : i32
    %c0_i32_1 = arith.constant 0 : i32
    return %c0_i32, %c0_i32_0 : i32, i32
  }
  func.func @transform_7(%arg0: i32) -> (i32, i32) {
    %c0_i32 = arith.constant 0 : i32
    %c0_i32_0 = arith.constant 0 : i32
    return %c0_i32, %arg0 : i32, i32
  }
}

</mosaic_0001>

<bundles_post_ra>
// kernel: tpu_custom_call.1
= control target key start
LH: loop header
LB: loop body
LE: loop exit
PB: predicated region body
PF: predicated region fallthrough
CT: control target
= control target key end

     0   :  { %v4475_v1 = vmov 0.0   ;;  %vm2916_vm0 = vmmov 0   ;;  %vm106_vm1 = vcmask 261120   ;;  %s4466_s0 = inlined_call_operand.vmem [shape: f32[300,32], index: 0, kind: input, shape index: {}]   ;;  %s4467_s1 = inlined_call_operand.vmem [shape: bf16[32,64], index: 1, kind: input, shape index: {}]   ;;  %s4468_s2 = inlined_call_operand.vmem [shape: f32[3,64], index: 2, kind: input, shape index: {}]   ;;  %s4469_s3 = inlined_call_operand.vmem [shape: bf16[64,64], index: 3, kind: input, shape index: {}]   ;;  %s4470_s4 = inlined_call_operand.vmem [shape: f32[1,64], index: 4, kind: input, shape index: {}]   ;;  %s4471_s5 = inlined_call_operand.vmem [shape: bf16[2,64], index: 5, kind: input, shape index: {}]   ;;  %s4472_s6 = inlined_call_operand.vmem [shape: f32[1,2], index: 6, kind: input, shape index: {}]   ;;  %s4473_s7 = inlined_call_operand.hbm [shape: f32[1,300], index: 7, kind: output, shape index: {}]  }
   0x1   :  { %v2650_v0 = vld [vmem:[%s4467_s1] sm:$0xff]   ;;  %2437 = vmatprep.subr.bf16.mxu0 %v4475_v1  ;;  %2621 = vmatprep.subr.bf16.mxu1 %v4475_v1  ;;  %v2651_v2 = vld [vmem:[%s4467_s1 + $0x8] sm:$0xff]   ;;  %v30_v6 = vld [vmem:[%s4466_s0 + $0x10] sm:$0xff] }
   0x2   :  { %2438 = vmatpush3.bf16.msra.mxu0 %v2650_v0  ;;  %2441 = vmatprep.mubr.msk.bf16.mxu0 %vm2916_vm0, %v4475_v1  ;;  %v28_v3 = vld [vmem:[%s4466_s0] sm:$0xff]  ;;  %v29_v4 = vld [vmem:[%s4466_s0 + $0x8] sm:$0xff]  ;;  %v31_v7 = vld [vmem:[%s4466_s0 + $0x18] sm:$0xff] }
   0x3   :  { %2439 = vmatprep.subr.bf16.mxu0 %v4475_v1  ;;  %2623 = vmatpush3.bf16.msra.mxu1 %v2650_v0  ;;  %v66_v5 = vpack.c.bf16 %v29_v4, %v28_v3  ;;  %v67_v8 = vpack.c.bf16 %v31_v7, %v30_v6  ;;  %v62_v9 = vld [vmem:[%s4466_s0 + $0x110] sm:$0xff]  ;;  %v63_v10 = vld [vmem:[%s4466_s0 + $0x118] sm:$0xff]  ;;  %v64_v12 = vld [vmem:[%s4466_s0 + $0x120] sm:$0xff] }
   0x4   :  { %2622 = vmatprep.subr.bf16.mxu1 %v4475_v1  ;;  %2509 = vmatprep.mubr.msk.bf16.mxu1 %vm2916_vm0, %v4475_v1  ;;  %v83_v11 = vpack.c.bf16 %v63_v10, %v62_v9  ;;  %v65_v13 = vld [vmem:[%s4466_s0 + $0x128] sm:$0xf] }
   0x6   :  { %2440 = vmatpush3.bf16.msra.mxu0 %v2651_v2 }
   0x7   :  { %2624 = vmatpush3.bf16.msra.mxu1 %v2651_v2 }
   0x8   :  { %2517 = vmatprep.subr.bf16.mxu1 %v4475_v1 }
   0x9   :  { %2442 = vmatmul.mubr.msk.bf16.vlgmr.msra.gmra.mrb[0].mxu0 %vm106_vm1, %v66_v5 }
   0xa   :  { %2445 = vmatprep.mubr.msk.bf16.mxu0 %vm2916_vm0, %v4475_v1  ;;  %2510 = vmatmul.mubr.msk.bf16.vlgmr.msra.gmra.mrb[0].mxu1 %vm106_vm1, %v83_v11 }
   0xb   :  { %2513 = vmatprep.mubr.msk.bf16.mxu1 %vm2916_vm0, %v4475_v1 }
  0x11   :  { %2446 = vmatmul.mubr.msk.bf16.gmra.mrb[4].mxu0 %vm106_vm1, %v67_v8 }
  0x12   :  { %12 = vsyncpa [#allocation3], 0  ;;  %2449 = vmatprep.mubr.msk.bf16.mxu0 %vm2916_vm0, %v4475_v1  ;;  %v32_v14 = vld [vmem:[%s4466_s0 + $0x20] sm:$0xff]  ;;  %v33_v15 = vld [vmem:[%s4466_s0 + $0x28] sm:$0xff]  ;;  %v84_v16 = vpack.c.bf16 %v65_v13, %v64_v12  ;;  %v4474_v60 = vlaneseq  ;;  %vm577_vm2 = vcmask 523264  }
  0x13   :  { %v68_v17 = vpack.c.bf16 %v33_v15, %v32_v14  ;;  %v34_v18 = vld [vmem:[%s4466_s0 + $0x30] sm:$0xff]  ;;  %v35_v19 = vld [vmem:[%s4466_s0 + $0x38] sm:$0xff]  ;;  %v36_v21 = vld [vmem:[%s4466_s0 + $0x40] sm:$0xff] }
  0x14   :  { %2514 = vmatmul.mubr.msk.bf16.gmra.mrb[4].mxu1 %vm106_vm1, %v84_v16  ;;  %v69_v20 = vpack.c.bf16 %v35_v19, %v34_v18  ;;  %v37_v22 = vld [vmem:[%s4466_s0 + $0x48] sm:$0xff]  ;;  %v38_v24 = vld [vmem:[%s4466_s0 + $0x50] sm:$0xff]  ;;  %v39_v25 = vld [vmem:[%s4466_s0 + $0x58] sm:$0xff]  ;;  %v3146_v61 = vshrl.u32 %v4474_v60, 7 }
  0x15   :  { %2525 = vmatprep.mubr.msk.bf16.mxu1 %vm2916_vm0, %v4475_v1  ;;  %v70_v23 = vpack.c.bf16 %v37_v22, %v36_v21  ;;  %v71_v26 = vpack.c.bf16 %v39_v25, %v38_v24  ;;  %v40_v27 = vld [vmem:[%s4466_s0 + $0x60] sm:$0xff]  ;;  %v41_v28 = vld [vmem:[%s4466_s0 + $0x68] sm:$0xff]  ;;  %v42_v30 = vld [vmem:[%s4466_s0 + $0x70] sm:$0xff] }
  0x16   :  { %v72_v29 = vpack.c.bf16 %v41_v28, %v40_v27  ;;  %v43_v31 = vld [vmem:[%s4466_s0 + $0x78] sm:$0xff]  ;;  %v44_v33 = vld [vmem:[%s4466_s0 + $0x80] sm:$0xff]  ;;  %v45_v34 = vld [vmem:[%s4466_s0 + $0x88] sm:$0xff]  ;;  %4478 = vst [vmem:[#allocation5_spill] sm:$0xff] %v3146_v61  ;;  %v3149_v62 = vsub.s32 0, %v3146_v61 }
  0x17   :  { %v73_v32 = vpack.c.bf16 %v43_v31, %v42_v30  ;;  %v74_v35 = vpack.c.bf16 %v45_v34, %v44_v33  ;;  %v46_v36 = vld [vmem:[%s4466_s0 + $0x90] sm:$0xff]  ;;  %v47_v37 = vld [vmem:[%s4466_s0 + $0x98] sm:$0xff]  ;;  %v48_v39 = vld [vmem:[%s4466_s0 + $0xa0] sm:$0xff] }
  0x18   :  { %v75_v38 = vpack.c.bf16 %v47_v37, %v46_v36  ;;  %v49_v40 = vld [vmem:[%s4466_s0 + $0xa8] sm:$0xff]  ;;  %v50_v42 = vld [vmem:[%s4466_s0 + $0xb0] sm:$0xff]  ;;  %v51_v43 = vld [vmem:[%s4466_s0 + $0xb8] sm:$0xff] }
  0x19   :  { %2450 = vmatmul.mubr.msk.bf16.gmra.mrb[8].mxu0 %vm106_vm1, %v68_v17  ;;  %v76_v41 = vpack.c.bf16 %v49_v40, %v48_v39  ;;  %v77_v44 = vpack.c.bf16 %v51_v43, %v50_v42  ;;  %v52_v45 = vld [vmem:[%s4466_s0 + $0xc0] sm:$0xff]  ;;  %v53_v46 = vld [vmem:[%s4466_s0 + $0xc8] sm:$0xff]  ;;  %v54_v48 = vld [vmem:[%s4466_s0 + $0xd0] sm:$0xff] }
  0x1a   :  { %2453 = vmatprep.mubr.msk.bf16.mxu0 %vm2916_vm0, %v4475_v1  ;;  %v78_v47 = vpack.c.bf16 %v53_v46, %v52_v45  ;;  %v55_v49 = vld [vmem:[%s4466_s0 + $0xd8] sm:$0xff]  ;;  %v56_v51 = vld [vmem:[%s4466_s0 + $0xe0] sm:$0xff]  ;;  %v57_v52 = vld [vmem:[%s4466_s0 + $0xe8] sm:$0xff] }
  0x1b   :  { %v79_v50 = vpack.c.bf16 %v55_v49, %v54_v48  ;;  %v80_v53 = vpack.c.bf16 %v57_v52, %v56_v51  ;;  %v58_v54 = vld [vmem:[%s4466_s0 + $0xf0] sm:$0xff]  ;;  %v59_v55 = vld [vmem:[%s4466_s0 + $0xf8] sm:$0xff]  ;;  %v60_v57 = vld [vmem:[%s4466_s0 + $0x100] sm:$0xff] }
  0x1c   :  { %v81_v56 = vpack.c.bf16 %v59_v55, %v58_v54  ;;  %v61_v58 = vld [vmem:[%s4466_s0 + $0x108] sm:$0xff]  ;;  %v89_v63 = vld [vmem:[%s4468_s2] sm:$0x7] }
  0x1d   :  { %v82_v59 = vpack.c.bf16 %v61_v58, %v60_v57  ;;  %v3155_v0 = vrot.slane %v89_v63, %v3149_v62 }
  0x21   :  { %2454 = vmatmul.mubr.msk.bf16.gmra.mrb[12].mxu0 %vm106_vm1, %v69_v20 }
  0x22   :  { %2457 = vmatprep.mubr.msk.bf16.mxu0 %vm2916_vm0, %v4475_v1 }
  0x29   :  { %2458 = vmatmul.mubr.msk.bf16.gmra.mrb[16].mxu0 %vm106_vm1, %v70_v23 }
  0x2a   :  { %2461 = vmatprep.mubr.msk.bf16.mxu0 %vm2916_vm0, %v4475_v1 }
  0x31   :  { %2462 = vmatmul.mubr.msk.bf16.gmra.mrb[20].mxu0 %vm106_vm1, %v71_v26 }
  0x32   :  { %2465 = vmatprep.mubr.msk.bf16.mxu0 %vm2916_vm0, %v4475_v1 }
  0x39   :  { %2466 = vmatmul.mubr.msk.bf16.gmra.mrb[24].mxu0 %vm106_vm1, %v72_v29 }
  0x3a   :  { %2469 = vmatprep.mubr.msk.bf16.mxu0 %vm2916_vm0, %v4475_v1 }
  0x41   :  { %2470 = vmatmul.mubr.msk.bf16.gmra.mrb[28].mxu0 %vm106_vm1, %v73_v32 }
  0x42   :  { %2473 = vmatprep.mubr.msk.bf16.mxu0 %vm2916_vm0, %v4475_v1 }
  0x49   :  { %2474 = vmatmul.mubr.msk.bf16.gmra.mrb[32].mxu0 %vm106_vm1, %v74_v35 }
  0x4a   :  { %2477 = vmatprep.mubr.msk.bf16.mxu0 %vm2916_vm0, %v4475_v1 }
  0x51   :  { %2478 = vmatmul.mubr.msk.bf16.gmra.mrb[36].mxu0 %vm106_vm1, %v75_v38 }
  0x52   :  { %2481 = vmatprep.mubr.msk.bf16.mxu0 %vm2916_vm0, %v4475_v1 }
  0x59   :  { %2482 = vmatmul.mubr.msk.bf16.gmra.mrb[40].mxu0 %vm106_vm1, %v76_v41 }
  0x5a   :  { %2485 = vmatprep.mubr.msk.bf16.mxu0 %vm2916_vm0, %v4475_v1 }
  0x61   :  { %2486 = vmatmul.mubr.msk.bf16.gmra.mrb[44].mxu0 %vm106_vm1, %v77_v44 }
  0x62   :  { %2489 = vmatprep.mubr.msk.bf16.mxu0 %vm2916_vm0, %v4475_v1 }
  0x69   :  { %2490 = vmatmul.mubr.msk.bf16.gmra.mrb[48].mxu0 %vm106_vm1, %v78_v47 }
  0x6a   :  { %2493 = vmatprep.mubr.msk.bf16.mxu0 %vm2916_vm0, %v4475_v1 }
  0x71   :  { %2494 = vmatmul.mubr.msk.bf16.gmra.mrb[52].mxu0 %vm106_vm1, %v79_v50 }
  0x72   :  { %2497 = vmatprep.mubr.msk.bf16.mxu0 %vm2916_vm0, %v4475_v1 }
  0x79   :  { %2498 = vmatmul.mubr.msk.bf16.gmra.mrb[56].mxu0 %vm106_vm1, %v80_v53 }
  0x7a   :  { %2501 = vmatprep.mubr.msk.bf16.mxu0 %vm2916_vm0, %v4475_v1 }
  0x81   :  { %2502 = vmatmul.mubr.msk.bf16.gmra.mrb[60].mxu0 %vm106_vm1, %v81_v56 }
  0x82   :  { %2505 = vmatprep.mubr.msk.bf16.mxu0 %vm2916_vm0, %v4475_v1 }
  0x89   :  { %2506 = vmatmul.mubr.msk.bf16.gmra.mrb[64].mxu0 %vm106_vm1, %v82_v59 }
  0xdc   :  { %v198_v2 = vpop.f32.mrb[0].mxu0 }
  0xdd   :  { %v199_v3 = vadd.f32 %v198_v2, %v3155_v0  ;;  %v2443_v4 = vpop.f32.mrb[1].mxu0  ;;  %v3160_v15 = vpop.f32.mrb[0].mxu1 }
  0xde   :  { %v201_v5 = vpop.f32.mrb[2].mxu0  ;;  %v2511_v17 = vpop.f32.mrb[1].mxu1 }
  0xdf   :  { %v387_v6 = vmin.f32 %v199_v3, 0.0  ;;  %v202_v7 = vadd.f32 %v201_v5, %v3155_v0  ;;  %v2444_v8 = vpop.f32.mrb[3].mxu0  ;;  %v3165_v21 = vpop.f32.mrb[2].mxu1  ;;  %vm349_vm3 = vcmp.gt.f32.partialorder %v199_v3, 0.0 }
  0xe0   :  { %v2512_v22 = vpop.f32.mrb[3].mxu1 }
  0xe1   :  { %v425_v9 = vmul.f32 1.442695, %v387_v6  ;;  %v388_v10 = vmin.f32 %v202_v7, 0.0  ;;  %vm350_vm4 = vcmp.gt.f32.partialorder %v202_v7, 0.0 }
  0xe3   :  { %2656 = vpow2.f32 %v425_v9  ;;  %v427_v11 = vmul.f32 1.442695, %v388_v10 }
  0xe4   :  { %v206_v12 = vpop.f32.mrb[4].mxu0 }
  0xe5   :  { %2658 = vpow2.f32 %v427_v11  ;;  %v207_v13 = vadd.f32 %v206_v12, %v3155_v0  ;;  %v2447_v14 = vpop.f32.mrb[5].mxu0 }
  0xe6   :  { %v209_v16 = vpop.f32.mrb[6].mxu0 }
  0xe7   :  { %v389_v18 = vmin.f32 %v207_v13, 0.0  ;;  %v3163_v19 = vadd.f32 %v209_v16, %v3155_v0  ;;  %v2448_v20 = vpop.f32.mrb[7].mxu0  ;;  %v3168_v26 = vpop.f32.mrb[4].mxu1  ;;  %vm351_vm5 = vcmp.gt.f32.partialorder %v207_v13, 0.0 }
  0xe8   :  { %v2515_v28 = vpop.f32.mrb[5].mxu1 }
  0xe9   :  { %v429_v23 = vmul.f32 1.442695, %v389_v18  ;;  %v390_v24 = vmin.f32 %v3163_v19, 0.0  ;;  %v3173_v32 = vpop.f32.mrb[6].mxu1  ;;  %vm352_vm6 = vcmp.gt.f32.partialorder %v3163_v19, 0.0 }
  0xea   :  { %v2516_v35 = vpop.f32.mrb[7].mxu1 }
  0xeb   :  { %2660 = vpow2.f32 %v429_v23  ;;  %v431_v25 = vmul.f32 1.442695, %v390_v24 }
  0xec   :  { %v214_v27 = vpop.f32.mrb[8].mxu0 }
  0xed   :  { %v2657_v29 = vpop.eup %2656  ;;  %2662 = vpow2.f32 %v431_v25  ;;  %v3171_v30 = vadd.f32 %v214_v27, %v3155_v0  ;;  %v2451_v31 = vpop.f32.mrb[9].mxu0 }
  0xee   :  { %v217_v33 = vpop.f32.mrb[10].mxu0  ;;  %v2245_v34 = vadd.f32 -1.0, %v2657_v29 }
  0xef   :  { %v2659_v36 = vpop.eup %2658  ;;  %v391_v37 = vmin.f32 %v3171_v30, 0.0  ;;  %v3177_v38 = vadd.f32 %v217_v33, %v3155_v0  ;;  %v2452_v39 = vpop.f32.mrb[11].mxu0  ;;  %vm353_vm7 = vcmp.gt.f32.partialorder %v3171_v30, 0.0 }
  0xf0   :  { %v3179_v40 = vsel %vm349_vm3, %v199_v3, %v2245_v34  ;;  %v2246_v41 = vadd.f32 -1.0, %v2659_v36 }
  0xf1   :  { %v433_v42 = vmul.f32 1.442695, %v391_v37  ;;  %v392_v43 = vmin.f32 %v3177_v38, 0.0  ;;  %v578_v44 = vsel %vm577_vm2, %v3179_v40, 0.0  ;;  %v732_v45 = vmul.f32 %v3179_v40, %v3179_v40 }
  0xf2   :  { %579 = vadd.xlane.f32.xlu0 %v578_v44  ;;  %v3186_v46 = vsel %vm350_vm4, %v202_v7, %v2246_v41  ;;  %vm354_vm8 = vcmp.gt.f32.partialorder %v3177_v38, 0.0 }
  0xf3   :  { %2664 = vpow2.f32 %v433_v42  ;;  %v435_v47 = vmul.f32 1.442695, %v392_v43  ;;  %v770_v48 = vsel %vm577_vm2, %v732_v45, 0.0  ;;  %v733_v50 = vmul.f32 %v3186_v46, %v3186_v46 }
  0xf4   :  { %771 = vadd.xlane.f32.xlu1 %v770_v48  ;;  %v222_v49 = vpop.f32.mrb[12].mxu0  ;;  %v581_v54 = vsel %vm577_vm2, %v3186_v46, 0.0 }
  0xf5   :  { %v2661_v51 = vpop.eup %2660  ;;  %2666 = vpow2.f32 %v435_v47  ;;  %v3192_v52 = vadd.f32 %v222_v49, %v3155_v0  ;;  %v2455_v53 = vpop.f32.mrb[13].mxu0  ;;  %v773_v2 = vsel %vm577_vm2, %v733_v50, 0.0 }
  0xf6   :  { %582 = vadd.xlane.f32.xlu0 %v581_v54  ;;  %v225_v55 = vpop.f32.mrb[14].mxu0  ;;  %v2247_v56 = vadd.f32 -1.0, %v2661_v51 }
  0xf7   :  { %v2663_v57 = vpop.eup %2662  ;;  %v393_v58 = vmin.f32 %v3192_v52, 0.0  ;;  %v3198_v59 = vadd.f32 %v225_v55, %v3155_v0  ;;  %v2456_v63 = vpop.f32.mrb[15].mxu0  ;;  %vm355_vm9 = vcmp.gt.f32.partialorder %v3192_v52, 0.0 }
  0xf8   :  { %774 = vadd.xlane.f32.xlu1 %v773_v2  ;;  %v3201_v3 = vsel %vm351_vm5, %v207_v13, %v2247_v56  ;;  %v2248_v4 = vadd.f32 -1.0, %v2663_v57 }
  0xf9   :  { %v437_v5 = vmul.f32 1.442695, %v393_v58  ;;  %v394_v6 = vmin.f32 %v3198_v59, 0.0  ;;  %v584_v7 = vsel %vm577_vm2, %v3201_v3, 0.0  ;;  %v734_v8 = vmul.f32 %v3201_v3, %v3201_v3 }
  0xfa   :  { %585 = vadd.xlane.f32.xlu0 %v584_v7  ;;  %v3210_v9 = vsel %vm352_vm6, %v3163_v19, %v2248_v4  ;;  %vm356_vm10 = vcmp.gt.f32.partialorder %v3198_v59, 0.0 }
  0xfb   :  { %2668 = vpow2.f32 %v437_v5  ;;  %v439_v10 = vmul.f32 1.442695, %v394_v6  ;;  %v587_v11 = vsel %vm577_vm2, %v3210_v9, 0.0  ;;  %v735_v13 = vmul.f32 %v3210_v9, %v3210_v9 }
  0xfc   :  { %588 = vadd.xlane.f32.xlu1 %v587_v11  ;;  %v230_v12 = vpop.f32.mrb[16].mxu0  ;;  %v776_v18 = vsel %vm577_vm2, %v734_v8, 0.0 }
  0xfd   :  { %v2665_v14 = vpop.eup %2664  ;;  %2670 = vpow2.f32 %v439_v10  ;;  %v3217_v16 = vadd.f32 %v230_v12, %v3155_v0  ;;  %v2459_v17 = vpop.f32.mrb[17].mxu0  ;;  %v779_v27 = vsel %vm577_vm2, %v735_v13, 0.0 }
  0xfe   :  { %777 = vadd.xlane.f32.xlu0 %v776_v18  ;;  %v233_v19 = vpop.f32.mrb[18].mxu0  ;;  %v2249_v20 = vadd.f32 -1.0, %v2665_v14 }
  0xff   :  { %v2667_v22 = vpop.eup %2666  ;;  %v395_v23 = vmin.f32 %v3217_v16, 0.0  ;;  %v3222_v24 = vadd.f32 %v233_v19, %v3155_v0  ;;  %v2460_v25 = vpop.f32.mrb[19].mxu0  ;;  %vm357_vm11 = vcmp.gt.f32.partialorder %v3217_v16, 0.0 }
 0x100   :  { %780 = vadd.xlane.f32.xlu1 %v779_v27  ;;  %v3227_v28 = vsel %vm353_vm7, %v3171_v30, %v2249_v20  ;;  %v2250_v29 = vadd.f32 -1.0, %v2667_v22  ;;  %v2652_v20 = vld [vmem:[%s4469_s3] sm:$0xff]  }
 0x101   :  { %v441_v31 = vmul.f32 1.442695, %v395_v23  ;;  %v396_v33 = vmin.f32 %v3222_v24, 0.0  ;;  %v590_v34 = vsel %vm577_vm2, %v3227_v28, 0.0  ;;  %v736_v35 = vmul.f32 %v3227_v28, %v3227_v28  ;;  %2518 = vmatpush3.bf16.msra.mxu1 %v2652_v20 }
 0x102   :  { %591 = vadd.xlane.f32.xlu0 %v590_v34  ;;  %v3236_v36 = vsel %vm354_vm8, %v3177_v38, %v2250_v29  ;;  %vm358_vm12 = vcmp.gt.f32.partialorder %v3222_v24, 0.0  ;;  %2519 = vmatprep.subr.bf16.mxu1 %v4475_v1 }
 0x103   :  { %2672 = vpow2.f32 %v441_v31  ;;  %v443_v37 = vmul.f32 1.442695, %v396_v33  ;;  %v593_v30 = vsel %vm577_vm2, %v3236_v36, 0.0  ;;  %v737_v41 = vmul.f32 %v3236_v36, %v3236_v36 }
 0x104   :  { %594 = vadd.xlane.f32.xlu1 %v593_v30  ;;  %v238_v39 = vpop.f32.mrb[20].mxu0  ;;  %v782_v45 = vsel %vm577_vm2, %v736_v35, 0.0  ;;  %v2653_v35 = vld [vmem:[%s4469_s3 + $0x8] sm:$0xff]  }
 0x105   :  { %v2669_v42 = vpop.eup %2668  ;;  %2674 = vpow2.f32 %v443_v37  ;;  %v3243_v43 = vadd.f32 %v238_v39, %v3155_v0  ;;  %v2463_v44 = vpop.f32.mrb[21].mxu0  ;;  %v785_v53 = vsel %vm577_vm2, %v737_v41, 0.0  ;;  %2520 = vmatpush3.bf16.msra.mxu1 %v2653_v35 }
 0x106   :  { %783 = vadd.xlane.f32.xlu0 %v782_v45  ;;  %v241_v38 = vpop.f32.mrb[22].mxu0  ;;  %v2251_v47 = vadd.f32 -1.0, %v2669_v42  ;;  %2521 = vmatprep.subr.bf16.mxu1 %v4475_v1 }
 0x107   :  { %v2671_v48 = vpop.eup %2670  ;;  %v397_v49 = vmin.f32 %v3243_v43, 0.0  ;;  %v3248_v50 = vadd.f32 %v241_v38, %v3155_v0  ;;  %v2464_v51 = vpop.f32.mrb[23].mxu0  ;;  %vm359_vm13 = vcmp.gt.f32.partialorder %v3243_v43, 0.0 }
 0x108   :  { %786 = vadd.xlane.f32.xlu1 %v785_v53  ;;  %v3253_v54 = vsel %vm355_vm9, %v3192_v52, %v2251_v47  ;;  %v2252_v55 = vadd.f32 -1.0, %v2671_v48  ;;  %v2654_v53 = vld [vmem:[%s4469_s3 + $0x10] sm:$0xff]  }
 0x109   :  { %v445_v56 = vmul.f32 1.442695, %v397_v49  ;;  %v398_v57 = vmin.f32 %v3248_v50, 0.0  ;;  %v596_v58 = vsel %vm577_vm2, %v3253_v54, 0.0  ;;  %v738_v63 = vmul.f32 %v3253_v54, %v3253_v54  ;;  %2522 = vmatpush3.bf16.msra.mxu1 %v2654_v53 }
 0x10a   :  { %597 = vadd.xlane.f32.xlu0 %v596_v58  ;;  %v3262_v2 = vsel %vm356_vm10, %v3198_v59, %v2252_v55  ;;  %vm360_vm14 = vcmp.gt.f32.partialorder %v3248_v50, 0.0  ;;  %2523 = vmatprep.subr.bf16.mxu1 %v4475_v1 }
 0x10b   :  { %2676 = vpow2.f32 %v445_v56  ;;  %v447_v4 = vmul.f32 1.442695, %v398_v57  ;;  %v599_v52 = vsel %vm577_vm2, %v3262_v2, 0.0  ;;  %v739_v6 = vmul.f32 %v3262_v2, %v3262_v2 }
 0x10c   :  { %600 = vadd.xlane.f32.xlu1 %v599_v52  ;;  %v246_v5 = vpop.f32.mrb[24].mxu0  ;;  %v788_v11 = vsel %vm577_vm2, %v738_v63, 0.0 }
 0x10d   :  { %v2673_v7 = vpop.eup %2672  ;;  %2678 = vpow2.f32 %v447_v4  ;;  %v3269_v8 = vadd.f32 %v246_v5, %v3155_v0  ;;  %v2467_v10 = vpop.f32.mrb[25].mxu0  ;;  %v791_v19 = vsel %vm577_vm2, %v739_v6, 0.0  ;;  %v2655_v6 = vld [vmem:[%s4469_s3 + $0x18] sm:$0xff]  }
 0x10e   :  { %789 = vadd.xlane.f32.xlu0 %v788_v11  ;;  %v249_v59 = vpop.f32.mrb[26].mxu0  ;;  %v2253_v12 = vadd.f32 -1.0, %v2673_v7  ;;  %2524 = vmatpush3.bf16.msra.mxu1 %v2655_v6 }
 0x10f   :  { %v2675_v13 = vpop.eup %2674  ;;  %v399_v14 = vmin.f32 %v3269_v8, 0.0  ;;  %v3274_v17 = vadd.f32 %v249_v59, %v3155_v0  ;;  %v2468_v18 = vpop.f32.mrb[27].mxu0  ;;  %2601 = vmatprep.subr.bf16.mxu1 %v4475_v1  ;;  %vm361_vm15 = vcmp.gt.f32.partialorder %v3269_v8, 0.0 }
 0x110   :  { %792 = vadd.xlane.f32.xlu1 %v791_v19  ;;  %v3282_v22 = vsel %vm357_vm11, %v3217_v16, %v2253_v12  ;;  %v2254_v23 = vadd.f32 -1.0, %v2675_v13 }
 0x111   :  { %v449_v25 = vmul.f32 1.442695, %v399_v14  ;;  %v400_v27 = vmin.f32 %v3274_v17, 0.0  ;;  %v602_v29 = vsel %vm577_vm2, %v3282_v22, 0.0  ;;  %v740_v31 = vmul.f32 %v3282_v22, %v3282_v22 }
 0x112   :  { %603 = vadd.xlane.f32.xlu0 %v602_v29  ;;  %v3291_v33 = vsel %vm358_vm12, %v3222_v24, %v2254_v23  ;;  %vm362_vm1 = vcmp.gt.f32.partialorder %v3274_v17, 0.0 }
 0x113   :  { %2680 = vpow2.f32 %v449_v25  ;;  %v451_v16 = vmul.f32 1.442695, %v400_v27  ;;  %v605_v34 = vsel %vm577_vm2, %v3291_v33, 0.0  ;;  %v741_v30 = vmul.f32 %v3291_v33, %v3291_v33 }
 0x114   :  { %606 = vadd.xlane.f32.xlu1 %v605_v34  ;;  %v254_v37 = vpop.f32.mrb[28].mxu0  ;;  %v794_v42 = vsel %vm577_vm2, %v740_v31, 0.0 }
 0x115   :  { %v2677_v39 = vpop.eup %2676  ;;  %2682 = vpow2.f32 %v451_v16  ;;  %v3302_v24 = vadd.f32 %v254_v37, %v3155_v0  ;;  %v2471_v41 = vpop.f32.mrb[29].mxu0  ;;  %v797_v51 = vsel %vm577_vm2, %v741_v30, 0.0 }
 0x116   :  { %795 = vadd.xlane.f32.xlu0 %v794_v42  ;;  %v257_v44 = vpop.f32.mrb[30].mxu0  ;;  %v2255_v45 = vadd.f32 -1.0, %v2677_v39 }
 0x117   :  { %v2679_v38 = vpop.eup %2678  ;;  %v401_v47 = vmin.f32 %v3302_v24, 0.0  ;;  %v3308_v48 = vadd.f32 %v257_v44, %v3155_v0  ;;  %v2472_v49 = vpop.f32.mrb[31].mxu0  ;;  %vm363_vm3 = vcmp.gt.f32.partialorder %v3302_v24, 0.0 }
 0x118   :  { %798 = vadd.xlane.f32.xlu1 %v797_v51  ;;  %v3316_v55 = vsel %vm359_vm13, %v3243_v43, %v2255_v45  ;;  %v2256_v56 = vadd.f32 -1.0, %v2679_v38 }
 0x119   :  { %v453_v57 = vmul.f32 1.442695, %v401_v47  ;;  %v402_v58 = vmin.f32 %v3308_v48, 0.0  ;;  %v608_v63 = vsel %vm577_vm2, %v3316_v55, 0.0  ;;  %v742_v4 = vmul.f32 %v3316_v55, %v3316_v55 }
 0x11a   :  { %609 = vadd.xlane.f32.xlu0 %v608_v63  ;;  %v3325_v52 = vsel %vm360_vm14, %v3248_v50, %v2256_v56  ;;  %vm364_vm4 = vcmp.gt.f32.partialorder %v3308_v48, 0.0 }
 0x11b   :  { %2684 = vpow2.f32 %v453_v57  ;;  %v455_v43 = vmul.f32 1.442695, %v402_v58  ;;  %v611_v5 = vsel %vm577_vm2, %v3325_v52, 0.0  ;;  %v743_v10 = vmul.f32 %v3325_v52, %v3325_v52 }
 0x11c   :  { %612 = vadd.xlane.f32.xlu1 %v611_v5  ;;  %v262_v7 = vpop.f32.mrb[32].mxu0  ;;  %v800_v12 = vsel %vm577_vm2, %v742_v4, 0.0 }
 0x11d   :  { %v2681_v11 = vpop.eup %2680  ;;  %2686 = vpow2.f32 %v455_v43  ;;  %v3336_v50 = vadd.f32 %v262_v7, %v3155_v0  ;;  %v2475_v59 = vpop.f32.mrb[33].mxu0  ;;  %v803_v25 = vsel %vm577_vm2, %v743_v10, 0.0 }
 0x11e   :  { %801 = vadd.xlane.f32.xlu0 %v800_v12  ;;  %v265_v13 = vpop.f32.mrb[34].mxu0  ;;  %v2257_v14 = vadd.f32 -1.0, %v2681_v11 }
 0x11f   :  { %v2683_v18 = vpop.eup %2682  ;;  %v403_v19 = vmin.f32 %v3336_v50, 0.0  ;;  %v3342_v20 = vadd.f32 %v265_v13, %v3155_v0  ;;  %v2476_v23 = vpop.f32.mrb[35].mxu0  ;;  %vm365_vm5 = vcmp.gt.f32.partialorder %v3336_v50, 0.0 }
 0x120   :  { %804 = vadd.xlane.f32.xlu1 %v803_v25  ;;  %v3347_v27 = vsel %vm361_vm15, %v3269_v8, %v2257_v14  ;;  %v2258_v29 = vadd.f32 -1.0, %v2683_v18 }
 0x121   :  { %v457_v31 = vmul.f32 1.442695, %v403_v19  ;;  %v404_v16 = vmin.f32 %v3342_v20, 0.0  ;;  %v614_v34 = vsel %vm577_vm2, %v3347_v27, 0.0  ;;  %v744_v35 = vmul.f32 %v3347_v27, %v3347_v27 }
 0x122   :  { %615 = vadd.xlane.f32.xlu0 %v614_v34  ;;  %v3356_v37 = vsel %vm362_vm1, %v3274_v17, %v2258_v29  ;;  %vm366_vm6 = vcmp.gt.f32.partialorder %v3342_v20, 0.0 }
 0x123   :  { %2688 = vpow2.f32 %v457_v31  ;;  %v459_v30 = vmul.f32 1.442695, %v404_v16  ;;  %v617_v8 = vsel %vm577_vm2, %v3356_v37, 0.0  ;;  %v745_v41 = vmul.f32 %v3356_v37, %v3356_v37 }
 0x124   :  { %618 = vadd.xlane.f32.xlu1 %v617_v8  ;;  %v270_v39 = vpop.f32.mrb[36].mxu0  ;;  %v806_v38 = vsel %vm577_vm2, %v744_v35, 0.0 }
 0x125   :  { %v2685_v42 = vpop.eup %2684  ;;  %2690 = vpow2.f32 %v459_v30  ;;  %v3363_v44 = vadd.f32 %v270_v39, %v3155_v0  ;;  %v2479_v45 = vpop.f32.mrb[37].mxu0  ;;  %v809_v57 = vsel %vm577_vm2, %v745_v41, 0.0 }
 0x126   :  { %807 = vadd.xlane.f32.xlu0 %v806_v38  ;;  %v273_v17 = vpop.f32.mrb[38].mxu0  ;;  %v2259_v47 = vadd.f32 -1.0, %v2685_v42 }
 0x127   :  { %v2687_v49 = vpop.eup %2686  ;;  %v405_v51 = vmin.f32 %v3363_v44, 0.0  ;;  %v3368_v53 = vadd.f32 %v273_v17, %v3155_v0  ;;  %v2480_v56 = vpop.f32.mrb[39].mxu0  ;;  %vm367_vm7 = vcmp.gt.f32.partialorder %v3363_v44, 0.0 }
 0x128   :  { %810 = vadd.xlane.f32.xlu1 %v809_v57  ;;  %v3373_v58 = vsel %vm363_vm3, %v3302_v24, %v2259_v47  ;;  %v2260_v63 = vadd.f32 -1.0, %v2687_v49 }
 0x129   :  { %v461_v4 = vmul.f32 1.442695, %v405_v51  ;;  %v406_v43 = vmin.f32 %v3368_v53, 0.0  ;;  %v620_v5 = vsel %vm577_vm2, %v3373_v58, 0.0  ;;  %v746_v6 = vmul.f32 %v3373_v58, %v3373_v58 }
 0x12a   :  { %621 = vadd.xlane.f32.xlu0 %v620_v5  ;;  %v3382_v7 = vsel %vm364_vm4, %v3308_v48, %v2260_v63  ;;  %vm368_vm8 = vcmp.gt.f32.partialorder %v3368_v53, 0.0 }
 0x12b   :  { %2692 = vpow2.f32 %v461_v4  ;;  %v463_v10 = vmul.f32 1.442695, %v406_v43  ;;  %v623_v24 = vsel %vm577_vm2, %v3382_v7, 0.0  ;;  %v747_v59 = vmul.f32 %v3382_v7, %v3382_v7 }
 0x12c   :  { %624 = vadd.xlane.f32.xlu1 %v623_v24  ;;  %v278_v11 = vpop.f32.mrb[40].mxu0  ;;  %v812_v18 = vsel %vm577_vm2, %v746_v6, 0.0 }
 0x12d   :  { %v2689_v12 = vpop.eup %2688  ;;  %2694 = vpow2.f32 %v463_v10  ;;  %v3389_v13 = vadd.f32 %v278_v11, %v3155_v0  ;;  %v2483_v14 = vpop.f32.mrb[41].mxu0  ;;  %v815_v16 = vsel %vm577_vm2, %v747_v59, 0.0 }
 0x12e   :  { %813 = vadd.xlane.f32.xlu0 %v812_v18  ;;  %v281_v48 = vpop.f32.mrb[42].mxu0  ;;  %v2261_v19 = vadd.f32 -1.0, %v2689_v12 }
 0x12f   :  { %v2691_v23 = vpop.eup %2690  ;;  %v407_v25 = vmin.f32 %v3389_v13, 0.0  ;;  %v3394_v29 = vadd.f32 %v281_v48, %v3155_v0  ;;  %v2484_v31 = vpop.f32.mrb[43].mxu0  ;;  %vm369_vm9 = vcmp.gt.f32.partialorder %v3389_v13, 0.0 }
 0x130   :  { %816 = vadd.xlane.f32.xlu1 %v815_v16  ;;  %v3399_v34 = vsel %vm365_vm5, %v3336_v50, %v2261_v19  ;;  %v2262_v35 = vadd.f32 -1.0, %v2691_v23 }
 0x131   :  { %v465_v30 = vmul.f32 1.442695, %v407_v25  ;;  %v408_v8 = vmin.f32 %v3394_v29, 0.0  ;;  %v626_v39 = vsel %vm577_vm2, %v3399_v34, 0.0  ;;  %v748_v41 = vmul.f32 %v3399_v34, %v3399_v34 }
 0x132   :  { %627 = vadd.xlane.f32.xlu0 %v626_v39  ;;  %v3408_v42 = vsel %vm366_vm6, %v3342_v20, %v2262_v35  ;;  %vm370_vm10 = vcmp.gt.f32.partialorder %v3394_v29, 0.0 }
 0x133   :  { %2696 = vpow2.f32 %v465_v30  ;;  %v467_v45 = vmul.f32 1.442695, %v408_v8  ;;  %v629_v50 = vsel %vm577_vm2, %v3408_v42, 0.0  ;;  %v749_v17 = vmul.f32 %v3408_v42, %v3408_v42 }
 0x134   :  { %630 = vadd.xlane.f32.xlu1 %v629_v50  ;;  %v286_v38 = vpop.f32.mrb[44].mxu0  ;;  %v818_v56 = vsel %vm577_vm2, %v748_v41, 0.0 }
 0x135   :  { %v2693_v47 = vpop.eup %2692  ;;  %2698 = vpow2.f32 %v467_v45  ;;  %v3415_v49 = vadd.f32 %v286_v38, %v3155_v0  ;;  %v2487_v51 = vpop.f32.mrb[45].mxu0  ;;  %v821_v6 = vsel %vm577_vm2, %v749_v17, 0.0 }
 0x136   :  { %819 = vadd.xlane.f32.xlu0 %v818_v56  ;;  %v289_v20 = vpop.f32.mrb[46].mxu0  ;;  %v2263_v57 = vadd.f32 -1.0, %v2693_v47 }
 0x137   :  { %v2695_v63 = vpop.eup %2694  ;;  %v409_v4 = vmin.f32 %v3415_v49, 0.0  ;;  %v3420_v43 = vadd.f32 %v289_v20, %v3155_v0  ;;  %v2488_v5 = vpop.f32.mrb[47].mxu0  ;;  %vm371_vm11 = vcmp.gt.f32.partialorder %v3415_v49, 0.0 }
 0x138   :  { %822 = vadd.xlane.f32.xlu1 %v821_v6  ;;  %v3425_v10 = vsel %vm367_vm7, %v3363_v44, %v2263_v57  ;;  %v2264_v24 = vadd.f32 -1.0, %v2695_v63 }
 0x139   :  { %v469_v11 = vmul.f32 1.442695, %v409_v4  ;;  %v410_v59 = vmin.f32 %v3420_v43, 0.0  ;;  %v632_v12 = vsel %vm577_vm2, %v3425_v10, 0.0  ;;  %v750_v14 = vmul.f32 %v3425_v10, %v3425_v10 }
 0x13a   :  { %633 = vadd.xlane.f32.xlu0 %v632_v12  ;;  %v3434_v18 = vsel %vm368_vm8, %v3368_v53, %v2264_v24  ;;  %vm372_vm12 = vcmp.gt.f32.partialorder %v3420_v43, 0.0 }
 0x13b   :  { %2700 = vpow2.f32 %v469_v11  ;;  %v471_v48 = vmul.f32 1.442695, %v410_v59  ;;  %v635_v44 = vsel %vm577_vm2, %v3434_v18, 0.0  ;;  %v751_v23 = vmul.f32 %v3434_v18, %v3434_v18 }
 0x13c   :  { %636 = vadd.xlane.f32.xlu1 %v635_v44  ;;  %v294_v19 = vpop.f32.mrb[48].mxu0  ;;  %v824_v35 = vsel %vm577_vm2, %v750_v14, 0.0 }
 0x13d   :  { %v2697_v25 = vpop.eup %2696  ;;  %2702 = vpow2.f32 %v471_v48  ;;  %v3441_v31 = vadd.f32 %v294_v19, %v3155_v0  ;;  %v2491_v16 = vpop.f32.mrb[49].mxu0  ;;  %v827_v50 = vsel %vm577_vm2, %v751_v23, 0.0 }
 0x13e   :  { %825 = vadd.xlane.f32.xlu0 %v824_v35  ;;  %v297_v53 = vpop.f32.mrb[50].mxu0  ;;  %v2265_v30 = vadd.f32 -1.0, %v2697_v25 }
 0x13f   :  { %v2699_v8 = vpop.eup %2698  ;;  %v411_v39 = vmin.f32 %v3441_v31, 0.0  ;;  %v3446_v41 = vadd.f32 %v297_v53, %v3155_v0  ;;  %v2492_v45 = vpop.f32.mrb[51].mxu0  ;;  %vm373_vm13 = vcmp.gt.f32.partialorder %v3441_v31, 0.0 }
 0x140   :  { %828 = vadd.xlane.f32.xlu1 %v827_v50  ;;  %v3451_v38 = vsel %vm369_vm9, %v3389_v13, %v2265_v30  ;;  %v2266_v17 = vadd.f32 -1.0, %v2699_v8 }
 0x141   :  { %v473_v47 = vmul.f32 1.442695, %v411_v39  ;;  %v412_v51 = vmin.f32 %v3446_v41, 0.0  ;;  %v638_v56 = vsel %vm577_vm2, %v3451_v38, 0.0  ;;  %v752_v20 = vmul.f32 %v3451_v38, %v3451_v38 }
 0x142   :  { %639 = vadd.xlane.f32.xlu0 %v638_v56  ;;  %v3460_v57 = vsel %vm370_vm10, %v3394_v29, %v2266_v17  ;;  %vm374_vm14 = vcmp.gt.f32.partialorder %v3446_v41, 0.0 }
 0x143   :  { %2704 = vpow2.f32 %v473_v47  ;;  %v475_v63 = vmul.f32 1.442695, %v412_v51  ;;  %v641_v13 = vsel %vm577_vm2, %v3460_v57, 0.0  ;;  %v753_v5 = vmul.f32 %v3460_v57, %v3460_v57 }
 0x144   :  { %642 = vadd.xlane.f32.xlu1 %v641_v13  ;;  %v302_v4 = vpop.f32.mrb[52].mxu0  ;;  %v830_v59 = vsel %vm577_vm2, %v752_v20, 0.0 }
 0x145   :  { %v2701_v6 = vpop.eup %2700  ;;  %2706 = vpow2.f32 %v475_v63  ;;  %v3467_v24 = vadd.f32 %v302_v4, %v3155_v0  ;;  %v2495_v11 = vpop.f32.mrb[53].mxu0  ;;  %v833_v23 = vsel %vm577_vm2, %v753_v5, 0.0 }
 0x146   :  { %831 = vadd.xlane.f32.xlu0 %v830_v59  ;;  %v305_v29 = vpop.f32.mrb[54].mxu0  ;;  %v2267_v12 = vadd.f32 -1.0, %v2701_v6 }
 0x147   :  { %v2703_v14 = vpop.eup %2702  ;;  %v413_v48 = vmin.f32 %v3467_v24, 0.0  ;;  %v3472_v44 = vadd.f32 %v305_v29, %v3155_v0  ;;  %v2496_v19 = vpop.f32.mrb[55].mxu0  ;;  %vm375_vm15 = vcmp.gt.f32.partialorder %v3467_v24, 0.0 }
 0x148   :  { %834 = vadd.xlane.f32.xlu1 %v833_v23  ;;  %v3477_v25 = vsel %vm371_vm11, %v3415_v49, %v2267_v12  ;;  %v2268_v16 = vadd.f32 -1.0, %v2703_v14 }
 0x149   :  { %v477_v35 = vmul.f32 1.442695, %v413_v48  ;;  %v414_v53 = vmin.f32 %v3472_v44, 0.0  ;;  %v644_v30 = vsel %vm577_vm2, %v3477_v25, 0.0  ;;  %v754_v8 = vmul.f32 %v3477_v25, %v3477_v25 }
 0x14a   :  { %645 = vadd.xlane.f32.xlu0 %v644_v30  ;;  %v3486_v39 = vsel %vm372_vm12, %v3420_v43, %v2268_v16  ;;  %vm376_vm1 = vcmp.gt.f32.partialorder %v3472_v44, 0.0 }
 0x14b   :  { %2708 = vpow2.f32 %v477_v35  ;;  %v479_v45 = vmul.f32 1.442695, %v414_v53  ;;  %v647_v49 = vsel %vm577_vm2, %v3486_v39, 0.0  ;;  %v755_v17 = vmul.f32 %v3486_v39, %v3486_v39 }
 0x14c   :  { %648 = vadd.xlane.f32.xlu1 %v647_v49  ;;  %v310_v50 = vpop.f32.mrb[56].mxu0  ;;  %v836_v20 = vsel %vm577_vm2, %v754_v8, 0.0 }
 0x14d   :  { %v2705_v47 = vpop.eup %2704  ;;  %2710 = vpow2.f32 %v479_v45  ;;  %v3493_v51 = vadd.f32 %v310_v50, %v3155_v0  ;;  %v2499_v56 = vpop.f32.mrb[57].mxu0  ;;  %v839_v11 = vsel %vm577_vm2, %v755_v17, 0.0  ;;  %v3524_v17 = vadd.f32 %v3160_v15, %v3155_v0 }
 0x14e   :  { %837 = vadd.xlane.f32.xlu0 %v836_v20  ;;  %v313_v43 = vpop.f32.mrb[58].mxu0  ;;  %v2269_v63 = vadd.f32 -1.0, %v2705_v47  ;;  %v3528_v47 = vadd.f32 %v3165_v21, %v3155_v0 }
 0x14f   :  { %v2707_v13 = vpop.eup %2706  ;;  %v415_v4 = vmin.f32 %v3493_v51, 0.0  ;;  %v3498_v5 = vadd.f32 %v313_v43, %v3155_v0  ;;  %v2500_v6 = vpop.f32.mrb[59].mxu0  ;;  %vm377_vm3 = vcmp.gt.f32.partialorder %v3493_v51, 0.0  ;;  %vm383_vm9 = vcmp.gt.f32.partialorder %v3524_v17, 0.0 }
 0x150   :  { %840 = vadd.xlane.f32.xlu1 %v839_v11  ;;  %v3503_v59 = vsel %vm373_vm13, %v3441_v31, %v2269_v63  ;;  %v2270_v29 = vadd.f32 -1.0, %v2707_v13  ;;  %vm384_vm10 = vcmp.gt.f32.partialorder %v3528_v47, 0.0  ;;  %vm689_vm13 = vcmask 519168  }
 0x151   :  { %v481_v12 = vmul.f32 1.442695, %v415_v4  ;;  %v416_v14 = vmin.f32 %v3498_v5, 0.0  ;;  %v650_v48 = vsel %vm577_vm2, %v3503_v59, 0.0  ;;  %v756_v19 = vmul.f32 %v3503_v59, %v3503_v59 }
 0x152   :  { %651 = vadd.xlane.f32.xlu0 %v650_v48  ;;  %v3512_v23 = vsel %vm374_vm14, %v3446_v41, %v2270_v29  ;;  %vm378_vm4 = vcmp.gt.f32.partialorder %v3498_v5, 0.0 }
 0x153   :  { %2712 = vpow2.f32 %v481_v12  ;;  %v483_v16 = vmul.f32 1.442695, %v416_v14  ;;  %v653_v31 = vsel %vm577_vm2, %v3512_v23, 0.0  ;;  %v757_v53 = vmul.f32 %v3512_v23, %v3512_v23 }
 0x154   :  { %654 = vadd.xlane.f32.xlu1 %v653_v31  ;;  %v318_v35 = vpop.f32.mrb[60].mxu0  ;;  %v842_v49 = vsel %vm577_vm2, %v756_v19, 0.0  ;;  %v421_v14 = vmin.f32 %v3524_v17, 0.0 }
 0x155   :  { %v2709_v30 = vpop.eup %2708  ;;  %2714 = vpow2.f32 %v483_v16  ;;  %v3519_v8 = vadd.f32 %v318_v35, %v3155_v0  ;;  %v2503_v45 = vpop.f32.mrb[61].mxu0  ;;  %v845_v13 = vsel %vm577_vm2, %v757_v53, 0.0 }
 0x156   :  { %843 = vadd.xlane.f32.xlu0 %v842_v49  ;;  %v321_v41 = vpop.f32.mrb[62].mxu0  ;;  %v2271_v50 = vadd.f32 -1.0, %v2709_v30 }
 0x157   :  { %v2711_v56 = vpop.eup %2710  ;;  %v417_v20 = vmin.f32 %v3519_v8, 0.0  ;;  %v3532_v43 = vadd.f32 %v321_v41, %v3155_v0  ;;  %v2504_v63 = vpop.f32.mrb[63].mxu0  ;;  %v493_v41 = vmul.f32 1.442695, %v421_v14  ;;  %vm379_vm5 = vcmp.gt.f32.partialorder %v3519_v8, 0.0 }
 0x158   :  { %846 = vadd.xlane.f32.xlu1 %v845_v13  ;;  %v3537_v4 = vsel %vm375_vm15, %v3467_v24, %v2271_v50  ;;  %v2272_v15 = vadd.f32 -1.0, %v2711_v56  ;;  %v422_v24 = vmin.f32 %v3528_v47, 0.0  ;;  %v3560_v56 = vadd.f32 %v3168_v26, %v3155_v0 }
 0x159   :  { %v485_v21 = vmul.f32 1.442695, %v417_v20  ;;  %v418_v6 = vmin.f32 %v3532_v43, 0.0  ;;  %v656_v11 = vsel %vm577_vm2, %v3537_v4, 0.0  ;;  %v758_v29 = vmul.f32 %v3537_v4, %v3537_v4 }
 0x15a   :  { %657 = vadd.xlane.f32.xlu0 %v656_v11  ;;  %v3546_v12 = vsel %vm376_vm1, %v3472_v44, %v2272_v15  ;;  %v495_v50 = vmul.f32 1.442695, %v422_v24  ;;  %v3574_v26 = vadd.f32 %v3173_v32, %v3155_v0  ;;  %v423_v32 = vmin.f32 %v3560_v56, 0.0 }
 0x15b   :  { %2716 = vpow2.f32 %v485_v21  ;;  %v487_v48 = vmul.f32 1.442695, %v418_v6  ;;  %v659_v19 = vsel %vm577_vm2, %v3546_v12, 0.0  ;;  %v759_v31 = vmul.f32 %v3546_v12, %v3546_v12 }
 0x15c   :  { %660 = vadd.xlane.f32.xlu1 %v659_v19  ;;  %v326_v16 = vpop.f32.mrb[64].mxu0  ;;  %v848_v30 = vsel %vm577_vm2, %v758_v29, 0.0  ;;  %vm380_vm6 = vcmp.gt.f32.partialorder %v3532_v43, 0.0  ;;  %vm385_vm11 = vcmp.gt.f32.partialorder %v3560_v56, 0.0  ;;  %vm386_vm12 = vcmp.gt.f32.partialorder %v3574_v26, 0.0 }
 0x15d   :  { %v2713_v35 = vpop.eup %2712  ;;  %2718 = vpow2.f32 %v487_v48  ;;  %v3555_v53 = vadd.f32 %v326_v16, %v3155_v0  ;;  %v2507_v44 = vpop.f32.mrb[65].mxu0  ;;  %v851_v21 = vsel %vm577_vm2, %v759_v31, 0.0 }
 0x15e   :  { %849 = vadd.xlane.f32.xlu0 %v848_v30  ;;  %v329_v45 = vpop.f32.mrb[66].mxu0  ;;  %v2273_v49 = vadd.f32 -1.0, %v2713_v35  ;;  %2720 = vpow2.f32 %v493_v41  ;;  %v424_v44 = vmin.f32 %v3574_v26, 0.0 }
 0x15f   :  { %v2715_v20 = vpop.eup %2714  ;;  %v419_v63 = vmin.f32 %v3555_v53, 0.0  ;;  %v3564_v13 = vadd.f32 %v329_v45, %v3155_v0  ;;  %v2508_v15 = vpop.f32.mrb[67].mxu0  ;;  %vm381_vm7 = vcmp.gt.f32.partialorder %v3555_v53, 0.0 }
 0x160   :  { %852 = vadd.xlane.f32.xlu1 %v851_v21  ;;  %v3569_v6 = vsel %vm377_vm3, %v3493_v51, %v2273_v49  ;;  %v2274_v11 = vadd.f32 -1.0, %v2715_v20  ;;  %v497_v49 = vmul.f32 1.442695, %v423_v32 }
 0x161   :  { %v489_v29 = vmul.f32 1.442695, %v419_v63  ;;  %v420_v14 = vmin.f32 %v3564_v13, 0.0  ;;  %v662_v24 = vsel %vm577_vm2, %v3569_v6, 0.0  ;;  %v760_v48 = vmul.f32 %v3569_v6, %v3569_v6 }
 0x162   :  { %663 = vadd.xlane.f32.xlu0 %v662_v24  ;;  %v3582_v51 = vsel %vm378_vm4, %v3498_v5, %v2274_v11  ;;  %v499_v63 = vmul.f32 1.442695, %v424_v44  ;;  %vm382_vm8 = vcmp.gt.f32.partialorder %v3564_v13, 0.0 }
 0x163   :  { %2722 = vpow2.f32 %v489_v29  ;;  %v491_v19 = vmul.f32 1.442695, %v420_v14  ;;  %v665_v0 = vsel %vm577_vm2, %v3582_v51, 0.0  ;;  %v761_v16 = vmul.f32 %v3582_v51, %v3582_v51 }
 0x164   :  { %666 = vadd.xlane.f32.xlu1 %v665_v0  ;;  %2724 = vpow2.f32 %v495_v50  ;;  %v854_v35 = vsel %vm577_vm2, %v760_v48, 0.0 }
 0x165   :  { %v2717_v31 = vpop.eup %2716  ;;  %2726 = vpow2.f32 %v491_v19  ;;  %v857_v45 = vsel %vm577_vm2, %v761_v16, 0.0 }
 0x166   :  { %855 = vadd.xlane.f32.xlu0 %v854_v35  ;;  %v2275_v5 = vadd.f32 -1.0, %v2717_v31  ;;  %2728 = vpow2.f32 %v497_v49 }
 0x167   :  { %v2719_v30 = vpop.eup %2718  ;;  %2730 = vpow2.f32 %v499_v63 }
 0x168   :  { %858 = vadd.xlane.f32.xlu1 %v857_v45  ;;  %v3594_v41 = vsel %vm379_vm5, %v3519_v8, %v2275_v5  ;;  %v2276_v50 = vadd.f32 -1.0, %v2719_v30  ;;  %v2721_v29 = vpop.eup %2720 }
 0x169   :  { %v668_v20 = vsel %vm577_vm2, %v3594_v41, 0.0  ;;  %v762_v15 = vmul.f32 %v3594_v41, %v3594_v41  ;;  %v2279_v31 = vadd.f32 -1.0, %v2721_v29 }
 0x16a   :  { %669 = vadd.xlane.f32.xlu0 %v668_v20  ;;  %v3602_v21 = vsel %vm380_vm6, %v3532_v43, %v2276_v50 }
 0x16b   :  { %v671_v11 = vsel %vm577_vm2, %v3602_v21, 0.0  ;;  %v763_v8 = vmul.f32 %v3602_v21, %v3602_v21  ;;  %v860_v24 = vsel %vm577_vm2, %v762_v15, 0.0  ;;  %v3630_v50 = vsel %vm383_vm9, %v3524_v17, %v2279_v31 }
 0x16c   :  { %672 = vadd.xlane.f32.xlu1 %v671_v11  ;;  %v680_v11 = vsel %vm577_vm2, %v3630_v50, 0.0 }
 0x16d   :  { %v2723_v14 = vpop.eup %2722  ;;  %v863_v0 = vsel %vm577_vm2, %v763_v8, 0.0  ;;  %v766_v8 = vmul.f32 %v3630_v50, %v3630_v50 }
 0x16e   :  { %v2725_v48 = vpop.eup %2724  ;;  %861 = vadd.xlane.f32.xlu0 %v860_v24  ;;  %v2277_v19 = vadd.f32 -1.0, %v2723_v14 }
 0x16f   :  { %v2727_v43 = vpop.eup %2726  ;;  %v2280_v30 = vadd.f32 -1.0, %v2725_v48 }
 0x170   :  { %864 = vadd.xlane.f32.xlu1 %v863_v0  ;;  %v3613_v32 = vsel %vm381_vm7, %v3555_v53, %v2277_v19  ;;  %v2278_v16 = vadd.f32 -1.0, %v2727_v43  ;;  %v2729_v20 = vpop.eup %2728 }
 0x171   :  { %v674_v35 = vsel %vm577_vm2, %v3613_v32, 0.0  ;;  %v764_v44 = vmul.f32 %v3613_v32, %v3613_v32  ;;  %v2731_v63 = vpop.eup %2730  ;;  %v2281_v29 = vadd.f32 -1.0, %v2729_v20 }
 0x172   :  { %675 = vadd.xlane.f32.xlu0 %v674_v35  ;;  %v3621_v5 = vsel %vm382_vm8, %v3564_v13, %v2278_v16  ;;  %v3633_v13 = vsel %vm384_vm10, %v3528_v47, %v2280_v30  ;;  %v2282_v14 = vadd.f32 -1.0, %v2731_v63  ;;  %v872_v47 = vsel %vm577_vm2, %v766_v8, 0.0 }
 0x173   :  { %v677_v45 = vsel %vm577_vm2, %v3621_v5, 0.0  ;;  %v866_v53 = vsel %vm577_vm2, %v764_v44, 0.0  ;;  %v765_v49 = vmul.f32 %v3621_v5, %v3621_v5  ;;  %v683_v17 = vsel %vm577_vm2, %v3633_v13, 0.0 }
 0x174   :  { %678 = vadd.xlane.f32.xlu1 %v677_v45  ;;  %v767_v24 = vmul.f32 %v3633_v13, %v3633_v13  ;;  %v3648_v48 = vsel %vm385_vm11, %v3560_v56, %v2281_v29  ;;  %v3651_v19 = vsel %vm386_vm12, %v3574_v26, %v2282_v14 }
 0x175   :  { %v869_v15 = vsel %vm577_vm2, %v765_v49, 0.0  ;;  %v686_v16 = vsel %vm577_vm2, %v3648_v48, 0.0  ;;  %v768_v31 = vmul.f32 %v3648_v48, %v3648_v48  ;;  %v690_v56 = vsel %vm689_vm13, %v3651_v19, 0.0 }
 0x176   :  { %867 = vadd.xlane.f32.xlu0 %v866_v53  ;;  %v875_v0 = vsel %vm577_vm2, %v767_v24, 0.0  ;;  %v769_v49 = vmul.f32 %v3651_v19, %v3651_v19 }
 0x177   :  { %v878_v53 = vsel %vm577_vm2, %v768_v31, 0.0 }
 0x178   :  { %870 = vadd.xlane.f32.xlu1 %v869_v15  ;;  %v881_v14 = vsel %vm689_vm13, %v769_v49, 0.0  ;;  %v1152_v49 = vsub.s32 1, %v3146_v61 }
 0x17a   :  { %681 = vadd.xlane.f32.xlu0 %v680_v11 }
 0x17c   :  { %684 = vadd.xlane.f32.xlu1 %v683_v17 }
 0x17e   :  { %873 = vadd.xlane.f32.xlu0 %v872_v47 }
 0x17f   :  { %v580_v43 = vpop.xlane.xlu0 %579 }
 0x180   :  { %v694_v35 = vmul.f32 0.015625, %v580_v43  ;;  %876 = vadd.xlane.f32.xlu1 %v875_v0 }
 0x181   :  { %v772_v44 = vpop.xlane.xlu1 %771 }
 0x182   :  { %v922_v30 = vmul.f32 %v694_v35, %v694_v35  ;;  %v884_v45 = vmul.f32 0.015625, %v772_v44  ;;  %687 = vadd.xlane.f32.xlu0 %v686_v16 }
 0x183   :  { %v583_v26 = vpop.xlane.xlu0 %582 }
 0x184   :  { %v960_v20 = vsub.f32 %v884_v45, %v922_v30  ;;  %v695_v63 = vmul.f32 0.015625, %v583_v26  ;;  %691 = vadd.xlane.f32.xlu1 %v690_v56 }
 0x185   :  { %v775_v15 = vpop.xlane.xlu1 %774 }
 0x186   :  { %v1036_v11 = vadd.f32 1e-05, %v960_v20  ;;  %v923_v8 = vmul.f32 %v695_v63, %v695_v63  ;;  %v885_v29 = vmul.f32 0.015625, %v775_v15  ;;  %879 = vadd.xlane.f32.xlu0 %v878_v53 }
 0x187   :  { %v586_v17 = vpop.xlane.xlu0 %585 }
 0x188   :  { %2732 = vrsqrt.f32 %v1036_v11  ;;  %v961_v47 = vsub.f32 %v885_v29, %v923_v8  ;;  %v696_v24 = vmul.f32 0.015625, %v586_v17  ;;  %882 = vadd.xlane.f32.xlu1 %v881_v14  ;;  %v998_v29 = vsub.f32 %v3179_v40, %v694_v35 }
 0x189   :  { %v589_v43 = vpop.xlane.xlu1 %588 }
 0x18a   :  { %v1037_v0 = vadd.f32 1e-05, %v961_v47  ;;  %v3664_v16 = vmul.f32 0.015625, %v589_v43  ;;  %v924_v44 = vmul.f32 %v696_v24, %v696_v24  ;;  %v2890_v43 = vld [vmem:[%s4468_s2] sm:$0x7] }
 0x18b   :  { %v778_v31 = vpop.xlane.xlu0 %777 }
 0x18c   :  { %2734 = vrsqrt.f32 %v1037_v0  ;;  %v886_v56 = vmul.f32 0.015625, %v778_v31  ;;  %v925_v45 = vmul.f32 %v3664_v16, %v3664_v16  ;;  %v3675_v0 = vrot.slane %v2890_v43, %v1152_v49 }
 0x18d   :  { %v781_v30 = vpop.xlane.xlu1 %780  ;;  %v1194_v31 = vsub.s32 2, %v3146_v61 }
 0x18e   :  { %v962_v26 = vsub.f32 %v886_v56, %v924_v44  ;;  %v887_v53 = vmul.f32 0.015625, %v781_v30 }
 0x18f   :  { %v592_v20 = vpop.xlane.xlu0 %591 }
 0x190   :  { %v1038_v15 = vadd.f32 1e-05, %v962_v26  ;;  %v963_v11 = vsub.f32 %v887_v53, %v925_v45  ;;  %v3669_v8 = vmul.f32 0.015625, %v592_v20  ;;  %v999_v45 = vsub.f32 %v3186_v46, %v695_v63 }
 0x191   :  { %v595_v17 = vpop.xlane.xlu1 %594 }
 0x192   :  { %v2733_v14 = vpop.eup %2732  ;;  %2736 = vrsqrt.f32 %v1038_v15  ;;  %v1039_v47 = vadd.f32 1e-05, %v963_v11  ;;  %v3678_v56 = vmul.f32 0.015625, %v595_v17  ;;  %v926_v40 = vmul.f32 %v3669_v8, %v3669_v8 }
 0x193   :  { %v1112_v44 = vmul.f32 %v2733_v14, %v998_v29  ;;  %v784_v30 = vpop.xlane.xlu0 %783  ;;  %v3685_v11 = vrot.slane %v2890_v43, %v1194_v31  ;;  %v1000_v43 = vsub.f32 %v3201_v3, %v696_v24 }
 0x194   :  { %2738 = vrsqrt.f32 %v1039_v47  ;;  %v888_v35 = vmul.f32 0.015625, %v784_v30  ;;  %v927_v20 = vmul.f32 %v3678_v56, %v3678_v56 }
 0x195   :  { %v787_v26 = vpop.xlane.xlu1 %786  ;;  %v1154_v29 = vmul.f32 %v3675_v0, %v1112_v44 }
 0x196   :  { %v2735_v53 = vpop.eup %2734  ;;  %v964_v49 = vsub.f32 %v888_v35, %v926_v40  ;;  %v889_v15 = vmul.f32 0.015625, %v787_v26 }
 0x197   :  { %v1113_v17 = vmul.f32 %v2735_v53, %v999_v45  ;;  %v598_v14 = vpop.xlane.xlu0 %597  ;;  %v1196_v61 = vadd.f32 %v3685_v11, %v1154_v29  ;;  %v1001_v53 = vsub.f32 %v3210_v9, %v3664_v16  ;;  %v4479_v9 = vmov 0.0  }
 0x198   :  { %v1040_v47 = vadd.f32 1e-05, %v964_v49  ;;  %v965_v60 = vsub.f32 %v889_v15, %v927_v20  ;;  %v3688_v1 = vmul.f32 0.015625, %v598_v14 }
 0x199   :  { %v1155_v30 = vmul.f32 %v3675_v0, %v1113_v17  ;;  %v601_v46 = vpop.xlane.xlu1 %600 }
 0x19a   :  { %2740 = vrsqrt.f32 %v1040_v47  ;;  %v1041_v63 = vadd.f32 1e-05, %v965_v60  ;;  %v3694_v31 = vmul.f32 0.015625, %v601_v46  ;;  %v928_v45 = vmul.f32 %v3688_v1, %v3688_v1 }
 0x19b   :  { %v1197_v40 = vadd.f32 %v3685_v11, %v1155_v30  ;;  %v790_v44 = vpop.xlane.xlu0 %789 }
 0x19c   :  { %v2737_v35 = vpop.eup %2736  ;;  %2742 = vrsqrt.f32 %v1041_v63  ;;  %v890_v26 = vmul.f32 0.015625, %v790_v44  ;;  %v929_v29 = vmul.f32 %v3694_v31, %v3694_v31 }
 0x19d   :  { %v793_v20 = vpop.xlane.xlu1 %792  ;;  %v1234_v60 = vpack.c.bf16 %v1197_v40, %v1196_v61  ;;  %v1114_v49 = vmul.f32 %v2737_v35, %v1000_v43  ;;  %v1002_v43 = vsub.f32 %v3227_v28, %v3669_v8 }
 0x19e   :  { %v2739_v15 = vpop.eup %2738  ;;  %v966_v3 = vsub.f32 %v890_v26, %v928_v45  ;;  %v891_v24 = vmul.f32 0.015625, %v793_v20 }
 0x19f   :  { %2526 = vmatmul.mubr.msk.bf16.vlgmr.msra.gmra.mrb[8].mxu1 %vm577_vm2, %v1234_v60  ;;  %v604_v17 = vpop.xlane.xlu0 %603  ;;  %v1115_v14 = vmul.f32 %v2739_v15, %v1001_v53  ;;  %v1156_v47 = vmul.f32 %v3675_v0, %v1114_v49  ;;  %v1003_v49 = vsub.f32 %v3236_v36, %v3678_v56 }
 0x1a0   :  { %v1042_v30 = vadd.f32 1e-05, %v966_v3  ;;  %v967_v46 = vsub.f32 %v891_v24, %v929_v29  ;;  %v3704_v63 = vmul.f32 0.015625, %v604_v17  ;;  %2529 = vmatprep.mubr.msk.bf16.mxu1 %vm2916_vm0, %v4479_v9 }
 0x1a1   :  { %v607_v61 = vpop.xlane.xlu1 %606  ;;  %v1157_v16 = vmul.f32 %v3675_v0, %v1115_v14  ;;  %v1198_v45 = vadd.f32 %v3685_v11, %v1156_v47 }
 0x1a2   :  { %2744 = vrsqrt.f32 %v1042_v30  ;;  %v1043_v40 = vadd.f32 1e-05, %v967_v46  ;;  %v3711_v44 = vmul.f32 0.015625, %v607_v61  ;;  %v930_v20 = vmul.f32 %v3704_v63, %v3704_v63 }
 0x1a3   :  { %v796_v35 = vpop.xlane.xlu0 %795  ;;  %v1199_v26 = vadd.f32 %v3685_v11, %v1157_v16 }
 0x1a4   :  { %v2741_v53 = vpop.eup %2740  ;;  %2746 = vrsqrt.f32 %v1043_v40  ;;  %v892_v60 = vmul.f32 0.015625, %v796_v35  ;;  %v931_v8 = vmul.f32 %v3711_v44, %v3711_v44 }
 0x1a5   :  { %v799_v15 = vpop.xlane.xlu1 %798  ;;  %v1235_v29 = vpack.c.bf16 %v1199_v26, %v1198_v45  ;;  %v1116_v3 = vmul.f32 %v2741_v53, %v1002_v43  ;;  %v1004_v43 = vsub.f32 %v3253_v54, %v3688_v1 }
 0x1a6   :  { %v2743_v28 = vpop.eup %2742  ;;  %v968_v24 = vsub.f32 %v892_v60, %v930_v20  ;;  %v893_v17 = vmul.f32 0.015625, %v799_v15  ;;  %v1005_v15 = vsub.f32 %v3262_v2, %v3694_v31 }
 0x1a7   :  { %2530 = vmatmul.mubr.msk.bf16.gmra.mrb[12].mxu1 %vm577_vm2, %v1235_v29  ;;  %v610_v14 = vpop.xlane.xlu0 %609  ;;  %v1117_v47 = vmul.f32 %v2743_v28, %v1003_v49  ;;  %v1158_v30 = vmul.f32 %v3675_v0, %v1116_v3 }
 0x1a8   :  { %v1044_v46 = vadd.f32 1e-05, %v968_v24  ;;  %v969_v61 = vsub.f32 %v893_v17, %v931_v8  ;;  %v3723_v16 = vmul.f32 0.015625, %v610_v14  ;;  %2533 = vmatprep.mubr.msk.bf16.mxu1 %vm2916_vm0, %v4479_v9 }
 0x1a9   :  { %v613_v36 = vpop.xlane.xlu1 %612  ;;  %v1159_v56 = vmul.f32 %v3675_v0, %v1117_v47  ;;  %v1200_v26 = vadd.f32 %v3685_v11, %v1158_v30 }
 0x1aa   :  { %2748 = vrsqrt.f32 %v1044_v46  ;;  %v1045_v40 = vadd.f32 1e-05, %v969_v61  ;;  %v3730_v35 = vmul.f32 0.015625, %v613_v36  ;;  %v932_v60 = vmul.f32 %v3723_v16, %v3723_v16 }
 0x1ab   :  { %v802_v45 = vpop.xlane.xlu0 %801  ;;  %v1201_v53 = vadd.f32 %v3685_v11, %v1159_v56  ;;  %v1006_v56 = vsub.f32 %v3282_v22, %v3704_v63 }
 0x1ac   :  { %v2745_v20 = vpop.eup %2744  ;;  %2750 = vrsqrt.f32 %v1045_v40  ;;  %v894_v49 = vmul.f32 0.015625, %v802_v45  ;;  %v933_v54 = vmul.f32 %v3730_v35, %v3730_v35 }
 0x1ad   :  { %v805_v29 = vpop.xlane.xlu1 %804  ;;  %v1236_v3 = vpack.c.bf16 %v1201_v53, %v1200_v26  ;;  %v1118_v28 = vmul.f32 %v2745_v20, %v1004_v43 }
 0x1ae   :  { %v2747_v1 = vpop.eup %2746  ;;  %v970_v8 = vsub.f32 %v894_v49, %v932_v60  ;;  %v895_v24 = vmul.f32 0.015625, %v805_v29  ;;  %v1007_v49 = vsub.f32 %v3291_v33, %v3711_v44 }
 0x1af   :  { %2534 = vmatmul.mubr.msk.bf16.gmra.mrb[16].mxu1 %vm577_vm2, %v1236_v3  ;;  %v616_v17 = vpop.xlane.xlu0 %615  ;;  %v1119_v14 = vmul.f32 %v2747_v1, %v1005_v15  ;;  %v1160_v47 = vmul.f32 %v3675_v0, %v1118_v28 }
 0x1b0   :  { %v1046_v30 = vadd.f32 1e-05, %v970_v8  ;;  %v971_v46 = vsub.f32 %v895_v24, %v933_v54  ;;  %v3742_v61 = vmul.f32 0.015625, %v616_v17  ;;  %2537 = vmatprep.mubr.msk.bf16.mxu1 %vm2916_vm0, %v4479_v9 }
 0x1b1   :  { %v619_v2 = vpop.xlane.xlu1 %618  ;;  %v1161_v31 = vmul.f32 %v3675_v0, %v1119_v14  ;;  %v1202_v45 = vadd.f32 %v3685_v11, %v1160_v47 }
 0x1b2   :  { %2752 = vrsqrt.f32 %v1046_v30  ;;  %v1047_v36 = vadd.f32 1e-05, %v971_v46  ;;  %v3749_v40 = vmul.f32 0.015625, %v619_v2  ;;  %v934_v20 = vmul.f32 %v3742_v61, %v3742_v61 }
 0x1b3   :  { %v808_v43 = vpop.xlane.xlu0 %807  ;;  %v1203_v26 = vadd.f32 %v3685_v11, %v1161_v31  ;;  %v1008_v46 = vsub.f32 %v3316_v55, %v3723_v16 }
 0x1b4   :  { %v2749_v53 = vpop.eup %2748  ;;  %2754 = vrsqrt.f32 %v1047_v36  ;;  %v896_v60 = vmul.f32 0.015625, %v808_v43  ;;  %v935_v63 = vmul.f32 %v3749_v40, %v3749_v40 }
 0x1b5   :  { %v811_v15 = vpop.xlane.xlu1 %810  ;;  %v1237_v29 = vpack.c.bf16 %v1203_v26, %v1202_v45  ;;  %v1120_v3 = vmul.f32 %v2749_v53, %v1006_v56  ;;  %v1009_v53 = vsub.f32 %v3325_v52, %v3730_v35 }
 0x1b6   :  { %v2751_v22 = vpop.eup %2750  ;;  %v972_v28 = vsub.f32 %v896_v60, %v934_v20  ;;  %v897_v1 = vmul.f32 0.015625, %v811_v15 }
 0x1b7   :  { %2538 = vmatmul.mubr.msk.bf16.gmra.mrb[20].mxu1 %vm577_vm2, %v1237_v29  ;;  %v622_v54 = vpop.xlane.xlu0 %621  ;;  %v1121_v8 = vmul.f32 %v2751_v22, %v1007_v49  ;;  %v1162_v24 = vmul.f32 %v3675_v0, %v1120_v3 }
 0x1b8   :  { %v1048_v17 = vadd.f32 1e-05, %v972_v28  ;;  %v973_v14 = vsub.f32 %v897_v1, %v935_v63  ;;  %v3761_v47 = vmul.f32 0.015625, %v622_v54  ;;  %2541 = vmatprep.mubr.msk.bf16.mxu1 %vm2916_vm0, %v4479_v9 }
 0x1b9   :  { %v625_v33 = vpop.xlane.xlu1 %624  ;;  %v1163_v44 = vmul.f32 %v3675_v0, %v1121_v8  ;;  %v1204_v36 = vadd.f32 %v3685_v11, %v1162_v24  ;;  %v1010_v24 = vsub.f32 %v3347_v27, %v3742_v61 }
 0x1ba   :  { %2756 = vrsqrt.f32 %v1048_v17  ;;  %v1049_v30 = vadd.f32 1e-05, %v973_v14  ;;  %v3768_v2 = vmul.f32 0.015625, %v625_v33  ;;  %v936_v45 = vmul.f32 %v3761_v47, %v3761_v47 }
 0x1bb   :  { %v814_v31 = vpop.xlane.xlu0 %813  ;;  %v1205_v56 = vadd.f32 %v3685_v11, %v1163_v44 }
 0x1bc   :  { %v2753_v43 = vpop.eup %2752  ;;  %2758 = vrsqrt.f32 %v1049_v30  ;;  %v898_v26 = vmul.f32 0.015625, %v814_v31  ;;  %v937_v16 = vmul.f32 %v3768_v2, %v3768_v2 }
 0x1bd   :  { %v817_v20 = vpop.xlane.xlu1 %816  ;;  %v1238_v60 = vpack.c.bf16 %v1205_v56, %v1204_v36  ;;  %v1122_v49 = vmul.f32 %v2753_v43, %v1008_v46  ;;  %v1011_v36 = vsub.f32 %v3356_v37, %v3749_v40 }
 0x1be   :  { %v2755_v55 = vpop.eup %2754  ;;  %v974_v15 = vsub.f32 %v898_v26, %v936_v45  ;;  %v899_v29 = vmul.f32 0.015625, %v817_v20 }
 0x1bf   :  { %2542 = vmatmul.mubr.msk.bf16.gmra.mrb[24].mxu1 %vm577_vm2, %v1238_v60  ;;  %v628_v3 = vpop.xlane.xlu0 %627  ;;  %v1123_v22 = vmul.f32 %v2755_v55, %v1009_v53  ;;  %v1164_v63 = vmul.f32 %v3675_v0, %v1122_v49 }
 0x1c0   :  { %v1050_v28 = vadd.f32 1e-05, %v974_v15  ;;  %v975_v1 = vsub.f32 %v899_v29, %v937_v16  ;;  %v3780_v54 = vmul.f32 0.015625, %v628_v3  ;;  %2545 = vmatprep.mubr.msk.bf16.mxu1 %vm2916_vm0, %v4479_v9  ;;  %v1012_v3 = vsub.f32 %v3373_v58, %v3761_v47 }
 0x1c1   :  { %v631_v52 = vpop.xlane.xlu1 %630  ;;  %v1165_v35 = vmul.f32 %v3675_v0, %v1123_v22  ;;  %v1206_v33 = vadd.f32 %v3685_v11, %v1164_v63 }
 0x1c2   :  { %2760 = vrsqrt.f32 %v1050_v28  ;;  %v1051_v8 = vadd.f32 1e-05, %v975_v1  ;;  %v3787_v17 = vmul.f32 0.015625, %v631_v52  ;;  %v938_v46 = vmul.f32 %v3780_v54, %v3780_v54 }
 0x1c3   :  { %v820_v14 = vpop.xlane.xlu0 %819  ;;  %v1207_v44 = vadd.f32 %v3685_v11, %v1165_v35 }
 0x1c4   :  { %v2757_v30 = vpop.eup %2756  ;;  %2762 = vrsqrt.f32 %v1051_v8  ;;  %v900_v31 = vmul.f32 0.015625, %v820_v14  ;;  %v939_v61 = vmul.f32 %v3787_v17, %v3787_v17 }
 0x1c5   :  { %v823_v56 = vpop.xlane.xlu1 %822  ;;  %v1239_v43 = vpack.c.bf16 %v1207_v44, %v1206_v33  ;;  %v1124_v45 = vmul.f32 %v2757_v30, %v1010_v24  ;;  %v1013_v24 = vsub.f32 %v3382_v7, %v3768_v2 }
 0x1c6   :  { %v2759_v27 = vpop.eup %2758  ;;  %v976_v26 = vsub.f32 %v900_v31, %v938_v46  ;;  %v901_v53 = vmul.f32 0.015625, %v823_v56 }
 0x1c7   :  { %2546 = vmatmul.mubr.msk.bf16.gmra.mrb[28].mxu1 %vm577_vm2, %v1239_v43  ;;  %v634_v20 = vpop.xlane.xlu0 %633  ;;  %v1125_v60 = vmul.f32 %v2759_v27, %v1011_v36  ;;  %v1166_v49 = vmul.f32 %v3675_v0, %v1124_v45 }
 0x1c8   :  { %v1052_v55 = vadd.f32 1e-05, %v976_v26  ;;  %v977_v16 = vsub.f32 %v901_v53, %v939_v61  ;;  %v3799_v15 = vmul.f32 0.015625, %v634_v20  ;;  %2549 = vmatprep.mubr.msk.bf16.mxu1 %vm2916_vm0, %v4479_v9  ;;  %v1014_v26 = vsub.f32 %v3399_v34, %v3780_v54 }
 0x1c9   :  { %v637_v37 = vpop.xlane.xlu1 %636  ;;  %v1167_v40 = vmul.f32 %v3675_v0, %v1125_v60  ;;  %v1208_v28 = vadd.f32 %v3685_v11, %v1166_v49 }
 0x1ca   :  { %2764 = vrsqrt.f32 %v1052_v55  ;;  %v1053_v29 = vadd.f32 1e-05, %v977_v16  ;;  %v3806_v22 = vmul.f32 0.015625, %v637_v37  ;;  %v940_v35 = vmul.f32 %v3799_v15, %v3799_v15 }
 0x1cb   :  { %v826_v63 = vpop.xlane.xlu0 %825  ;;  %v1209_v1 = vadd.f32 %v3685_v11, %v1167_v40  ;;  %v1015_v40 = vsub.f32 %v3408_v42, %v3787_v17 }
 0x1cc   :  { %v2761_v52 = vpop.eup %2760  ;;  %2766 = vrsqrt.f32 %v1053_v29  ;;  %v902_v8 = vmul.f32 0.015625, %v826_v63  ;;  %v941_v47 = vmul.f32 %v3806_v22, %v3806_v22 }
 0x1cd   :  { %v829_v14 = vpop.xlane.xlu1 %828  ;;  %v1240_v33 = vpack.c.bf16 %v1209_v1, %v1208_v28  ;;  %v1126_v44 = vmul.f32 %v2761_v52, %v1012_v3 }
 0x1ce   :  { %v2763_v58 = vpop.eup %2762  ;;  %v978_v30 = vsub.f32 %v902_v8, %v940_v35  ;;  %v903_v46 = vmul.f32 0.015625, %v829_v14 }
 0x1cf   :  { %2550 = vmatmul.mubr.msk.bf16.gmra.mrb[32].mxu1 %vm577_vm2, %v1240_v33  ;;  %v640_v31 = vpop.xlane.xlu0 %639  ;;  %v1127_v36 = vmul.f32 %v2763_v58, %v1013_v24  ;;  %v1168_v56 = vmul.f32 %v3675_v0, %v1126_v44  ;;  %v1016_v58 = vsub.f32 %v3425_v10, %v3799_v15 }
 0x1d0   :  { %v1054_v43 = vadd.f32 1e-05, %v978_v30  ;;  %v979_v45 = vsub.f32 %v903_v46, %v941_v47  ;;  %v3818_v27 = vmul.f32 0.015625, %v640_v31  ;;  %2553 = vmatprep.mubr.msk.bf16.mxu1 %vm2916_vm0, %v4479_v9 }
 0x1d1   :  { %v643_v7 = vpop.xlane.xlu1 %642  ;;  %v1169_v2 = vmul.f32 %v3675_v0, %v1127_v36  ;;  %v1210_v60 = vadd.f32 %v3685_v11, %v1168_v56 }
 0x1d2   :  { %2768 = vrsqrt.f32 %v1054_v43  ;;  %v1055_v61 = vadd.f32 1e-05, %v979_v45  ;;  %v3825_v53 = vmul.f32 0.015625, %v643_v7  ;;  %v942_v16 = vmul.f32 %v3818_v27, %v3818_v27 }
 0x1d3   :  { %v832_v20 = vpop.xlane.xlu0 %831  ;;  %v1211_v49 = vadd.f32 %v3685_v11, %v1169_v2  ;;  %v1017_v45 = vsub.f32 %v3434_v18, %v3806_v22 }
 0x1d4   :  { %v2765_v55 = vpop.eup %2764  ;;  %2770 = vrsqrt.f32 %v1055_v61  ;;  %v904_v37 = vmul.f32 0.015625, %v832_v20  ;;  %v943_v54 = vmul.f32 %v3825_v53, %v3825_v53 }
 0x1d5   :  { %v835_v29 = vpop.xlane.xlu1 %834  ;;  %v1241_v3 = vpack.c.bf16 %v1211_v49, %v1210_v60  ;;  %v1128_v63 = vmul.f32 %v2765_v55, %v1014_v26 }
 0x1d6   :  { %v2767_v34 = vpop.eup %2766  ;;  %v980_v28 = vsub.f32 %v904_v37, %v942_v16  ;;  %v905_v1 = vmul.f32 0.015625, %v835_v29 }
 0x1d7   :  { %2554 = vmatmul.mubr.msk.bf16.gmra.mrb[36].mxu1 %vm577_vm2, %v1241_v3  ;;  %v646_v52 = vpop.xlane.xlu0 %645  ;;  %v1129_v35 = vmul.f32 %v2767_v34, %v1015_v40  ;;  %v1170_v8 = vmul.f32 %v3675_v0, %v1128_v63  ;;  %v1018_v3 = vsub.f32 %v3451_v38, %v3818_v27 }
 0x1d8   :  { %v1056_v24 = vadd.f32 1e-05, %v980_v28  ;;  %v981_v14 = vsub.f32 %v905_v1, %v943_v54  ;;  %v3837_v33 = vmul.f32 0.015625, %v646_v52  ;;  %2557 = vmatprep.mubr.msk.bf16.mxu1 %vm2916_vm0, %v4479_v9 }
 0x1d9   :  { %v649_v42 = vpop.xlane.xlu1 %648  ;;  %v1171_v17 = vmul.f32 %v3675_v0, %v1129_v35  ;;  %v1212_v46 = vadd.f32 %v3685_v11, %v1170_v8  ;;  %v1019_v8 = vsub.f32 %v3460_v57, %v3825_v53 }
 0x1da   :  { %2772 = vrsqrt.f32 %v1056_v24  ;;  %v1057_v44 = vadd.f32 1e-05, %v981_v14  ;;  %v3844_v47 = vmul.f32 0.015625, %v649_v42  ;;  %v944_v56 = vmul.f32 %v3837_v33, %v3837_v33 }
 0x1db   :  { %v838_v30 = vpop.xlane.xlu0 %837  ;;  %v1213_v31 = vadd.f32 %v3685_v11, %v1171_v17 }
 0x1dc   :  { %v2769_v36 = vpop.eup %2768  ;;  %2774 = vrsqrt.f32 %v1057_v44  ;;  %v906_v43 = vmul.f32 0.015625, %v838_v30  ;;  %v945_v15 = vmul.f32 %v3844_v47, %v3844_v47 }
 0x1dd   :  { %v841_v7 = vpop.xlane.xlu1 %840  ;;  %v1242_v2 = vpack.c.bf16 %v1213_v31, %v1212_v46  ;;  %v1130_v61 = vmul.f32 %v2769_v36, %v1016_v58 }
 0x1de   :  { %v2771_v10 = vpop.eup %2770  ;;  %v982_v26 = vsub.f32 %v906_v43, %v944_v56  ;;  %v907_v20 = vmul.f32 0.015625, %v841_v7 }
 0x1df   :  { %2558 = vmatmul.mubr.msk.bf16.gmra.mrb[40].mxu1 %vm577_vm2, %v1242_v2  ;;  %v652_v60 = vpop.xlane.xlu0 %651  ;;  %v1131_v49 = vmul.f32 %v2771_v10, %v1017_v45  ;;  %v1172_v55 = vmul.f32 %v3675_v0, %v1130_v61  ;;  %v1020_v45 = vsub.f32 %v3477_v25, %v3837_v33 }
 0x1e0   :  { %v1058_v16 = vadd.f32 1e-05, %v982_v26  ;;  %v983_v37 = vsub.f32 %v907_v20, %v945_v15  ;;  %v3856_v40 = vmul.f32 0.015625, %v652_v60  ;;  %2561 = vmatprep.mubr.msk.bf16.mxu1 %vm2916_vm0, %v4479_v9  ;;  %v1021_v60 = vsub.f32 %v3486_v39, %v3844_v47 }
 0x1e1   :  { %v655_v18 = vpop.xlane.xlu1 %654  ;;  %v1173_v22 = vmul.f32 %v3675_v0, %v1131_v49  ;;  %v1214_v54 = vadd.f32 %v3685_v11, %v1172_v55 }
 0x1e2   :  { %2776 = vrsqrt.f32 %v1058_v16  ;;  %v1059_v29 = vadd.f32 1e-05, %v983_v37  ;;  %v3863_v63 = vmul.f32 0.015625, %v655_v18  ;;  %v946_v52 = vmul.f32 %v3856_v40, %v3856_v40 }
 0x1e3   :  { %v844_v34 = vpop.xlane.xlu0 %843  ;;  %v1215_v28 = vadd.f32 %v3685_v11, %v1173_v22 }
 0x1e4   :  { %v2773_v1 = vpop.eup %2772  ;;  %2778 = vrsqrt.f32 %v1059_v29  ;;  %v908_v35 = vmul.f32 0.015625, %v844_v34  ;;  %v947_v27 = vmul.f32 %v3863_v63, %v3863_v63 }
 0x1e5   :  { %v847_v24 = vpop.xlane.xlu1 %846  ;;  %v1243_v14 = vpack.c.bf16 %v1215_v28, %v1214_v54  ;;  %v1132_v42 = vmul.f32 %v2773_v1, %v1018_v3 }
 0x1e6   :  { %v2775_v38 = vpop.eup %2774  ;;  %v984_v17 = vsub.f32 %v908_v35, %v946_v52  ;;  %v909_v44 = vmul.f32 0.015625, %v847_v24  ;;  %v1022_v52 = vsub.f32 %v3503_v59, %v3856_v40 }
 0x1e7   :  { %2562 = vmatmul.mubr.msk.bf16.gmra.mrb[44].mxu1 %vm577_vm2, %v1243_v14  ;;  %v658_v58 = vpop.xlane.xlu0 %657  ;;  %v1133_v30 = vmul.f32 %v2775_v38, %v1019_v8  ;;  %v1174_v46 = vmul.f32 %v3675_v0, %v1132_v42 }
 0x1e8   :  { %v1060_v31 = vadd.f32 1e-05, %v984_v17  ;;  %v985_v36 = vsub.f32 %v909_v44, %v947_v27  ;;  %v3875_v56 = vmul.f32 0.015625, %v658_v58  ;;  %2565 = vmatprep.mubr.msk.bf16.mxu1 %vm2916_vm0, %v4479_v9  ;;  %v1023_v17 = vsub.f32 %v3512_v23, %v3863_v63 }
 0x1e9   :  { %v661_v57 = vpop.xlane.xlu1 %660  ;;  %v1175_v53 = vmul.f32 %v3675_v0, %v1133_v30  ;;  %v1216_v61 = vadd.f32 %v3685_v11, %v1174_v46 }
 0x1ea   :  { %2780 = vrsqrt.f32 %v1060_v31  ;;  %v1061_v43 = vadd.f32 1e-05, %v985_v36  ;;  %v3882_v7 = vmul.f32 0.015625, %v661_v57  ;;  %v948_v26 = vmul.f32 %v3875_v56, %v3875_v56 }
 0x1eb   :  { %v850_v2 = vpop.xlane.xlu0 %849  ;;  %v1217_v10 = vadd.f32 %v3685_v11, %v1175_v53 }
 0x1ec   :  { %v2777_v15 = vpop.eup %2776  ;;  %2782 = vrsqrt.f32 %v1061_v43  ;;  %v910_v20 = vmul.f32 0.015625, %v850_v2  ;;  %v949_v33 = vmul.f32 %v3882_v7, %v3882_v7 }
 0x1ed   :  { %v853_v49 = vpop.xlane.xlu1 %852  ;;  %v1244_v55 = vpack.c.bf16 %v1217_v10, %v1216_v61  ;;  %v1134_v16 = vmul.f32 %v2777_v15, %v1020_v45  ;;  %v1024_v10 = vsub.f32 %v3537_v4, %v3875_v56 }
 0x1ee   :  { %v2779_v25 = vpop.eup %2778  ;;  %v986_v37 = vsub.f32 %v910_v20, %v948_v26  ;;  %v911_v18 = vmul.f32 0.015625, %v853_v49 }
 0x1ef   :  { %2566 = vmatmul.mubr.msk.bf16.gmra.mrb[48].mxu1 %vm577_vm2, %v1244_v55  ;;  %v664_v22 = vpop.xlane.xlu0 %663  ;;  %v1135_v29 = vmul.f32 %v2779_v25, %v1021_v60  ;;  %v1176_v3 = vmul.f32 %v3675_v0, %v1134_v16  ;;  %v1025_v25 = vsub.f32 %v3546_v12, %v3882_v7 }
 0x1f0   :  { %v1062_v34 = vadd.f32 1e-05, %v986_v37  ;;  %v987_v54 = vsub.f32 %v911_v18, %v949_v33  ;;  %v3894_v28 = vmul.f32 0.015625, %v664_v22  ;;  %2569 = vmatprep.mubr.msk.bf16.mxu1 %vm2916_vm0, %v4479_v9 }
 0x1f1   :  { %v667_v39 = vpop.xlane.xlu1 %666  ;;  %v1177_v47 = vmul.f32 %v3675_v0, %v1135_v29  ;;  %v1218_v24 = vadd.f32 %v3685_v11, %v1176_v3 }
 0x1f2   :  { %2784 = vrsqrt.f32 %v1062_v34  ;;  %v1063_v1 = vadd.f32 1e-05, %v987_v54  ;;  %v3901_v35 = vmul.f32 0.015625, %v667_v39  ;;  %v950_v38 = vmul.f32 %v3894_v28, %v3894_v28 }
 0x1f3   :  { %v856_v8 = vpop.xlane.xlu0 %855  ;;  %v1219_v14 = vadd.f32 %v3685_v11, %v1177_v47 }
 0x1f4   :  { %v2781_v42 = vpop.eup %2780  ;;  %2786 = vrsqrt.f32 %v1063_v1  ;;  %v912_v27 = vmul.f32 0.015625, %v856_v8  ;;  %v951_v40 = vmul.f32 %v3901_v35, %v3901_v35 }
 0x1f5   :  { %v859_v44 = vpop.xlane.xlu1 %858  ;;  %v1245_v58 = vpack.c.bf16 %v1219_v14, %v1218_v24  ;;  %v1136_v30 = vmul.f32 %v2781_v42, %v1022_v52  ;;  %v1026_v24 = vsub.f32 %v3569_v6, %v3894_v28 }
 0x1f6   :  { %v2783_v59 = vpop.eup %2782  ;;  %v988_v46 = vsub.f32 %v912_v27, %v950_v38  ;;  %v913_v31 = vmul.f32 0.015625, %v859_v44 }
 0x1f7   :  { %2570 = vmatmul.mubr.msk.bf16.gmra.mrb[52].mxu1 %vm577_vm2, %v1245_v58  ;;  %v670_v36 = vpop.xlane.xlu0 %669  ;;  %v1137_v57 = vmul.f32 %v2783_v59, %v1023_v17  ;;  %v1178_v53 = vmul.f32 %v3675_v0, %v1136_v30  ;;  %v1027_v58 = vsub.f32 %v3582_v51, %v3901_v35 }
 0x1f8   :  { %v1064_v43 = vadd.f32 1e-05, %v988_v46  ;;  %v989_v45 = vsub.f32 %v913_v31, %v951_v40  ;;  %v3913_v2 = vmul.f32 0.015625, %v670_v36  ;;  %2573 = vmatprep.mubr.msk.bf16.mxu1 %vm2916_vm0, %v4479_v9 }
 0x1f9   :  { %v673_v23 = vpop.xlane.xlu1 %672  ;;  %v1179_v63 = vmul.f32 %v3675_v0, %v1137_v57  ;;  %v1220_v20 = vadd.f32 %v3685_v11, %v1178_v53 }
 0x1fa   :  { %2788 = vrsqrt.f32 %v1064_v43  ;;  %v1065_v61 = vadd.f32 1e-05, %v989_v45  ;;  %v3920_v15 = vmul.f32 0.015625, %v673_v23  ;;  %v952_v55 = vmul.f32 %v3913_v2, %v3913_v2 }
 0x1fb   :  { %v862_v26 = vpop.xlane.xlu0 %861  ;;  %v1221_v60 = vadd.f32 %v3685_v11, %v1179_v63 }
 0x1fc   :  { %v2785_v49 = vpop.eup %2784  ;;  %2790 = vrsqrt.f32 %v1065_v61  ;;  %v914_v16 = vmul.f32 0.015625, %v862_v26  ;;  %v953_v56 = vmul.f32 %v3920_v15, %v3920_v15 }
 0x1fd   :  { %v865_v33 = vpop.xlane.xlu1 %864  ;;  %v1246_v37 = vpack.c.bf16 %v1221_v60, %v1220_v20  ;;  %v1138_v18 = vmul.f32 %v2785_v49, %v1024_v10  ;;  %v1028_v10 = vsub.f32 %v3594_v41, %v3913_v2 }
 0x1fe   :  { %v2787_v4 = vpop.eup %2786  ;;  %v990_v22 = vsub.f32 %v914_v16, %v952_v55  ;;  %v915_v29 = vmul.f32 0.015625, %v865_v33 }
 0x1ff   :  { %2574 = vmatmul.mubr.msk.bf16.gmra.mrb[56].mxu1 %vm577_vm2, %v1246_v37  ;;  %v676_v3 = vpop.xlane.xlu0 %675  ;;  %v1139_v34 = vmul.f32 %v2787_v4, %v1025_v25  ;;  %v1180_v54 = vmul.f32 %v3675_v0, %v1138_v18  ;;  %v1029_v25 = vsub.f32 %v3602_v21, %v3920_v15 }
 0x200   :  { %v1066_v39 = vadd.f32 1e-05, %v990_v22  ;;  %v991_v47 = vsub.f32 %v915_v29, %v953_v56  ;;  %v3932_v1 = vmul.f32 0.015625, %v676_v3  ;;  %2577 = vmatprep.mubr.msk.bf16.mxu1 %vm2916_vm0, %v4479_v9 }
 0x201   :  { %v679_v12 = vpop.xlane.xlu1 %678  ;;  %v1181_v7 = vmul.f32 %v3675_v0, %v1139_v34  ;;  %v1222_v38 = vadd.f32 %v3685_v11, %v1180_v54 }
 0x202   :  { %2792 = vrsqrt.f32 %v1066_v39  ;;  %v1067_v52 = vadd.f32 1e-05, %v991_v47  ;;  %v954_v8 = vmul.f32 %v3932_v1, %v3932_v1  ;;  %v3941_v14 = vmul.f32 0.015625, %v679_v12 }
 0x203   :  { %v868_v42 = vpop.xlane.xlu0 %867  ;;  %v1223_v27 = vadd.f32 %v3685_v11, %v1181_v7  ;;  %v1030_v7 = vsub.f32 %v3613_v32, %v3932_v1 }
 0x204   :  { %v2789_v17 = vpop.eup %2788  ;;  %2794 = vrsqrt.f32 %v1067_v52  ;;  %v916_v44 = vmul.f32 0.015625, %v868_v42  ;;  %v955_v6 = vmul.f32 %v3941_v14, %v3941_v14 }
 0x205   :  { %v871_v30 = vpop.xlane.xlu1 %870  ;;  %v1247_v59 = vpack.c.bf16 %v1223_v27, %v1222_v38  ;;  %v1140_v40 = vmul.f32 %v2789_v17, %v1026_v24  ;;  %v1031_v17 = vsub.f32 %v3621_v5, %v3941_v14 }
 0x206   :  { %v2791_v46 = vpop.eup %2790  ;;  %v992_v28 = vsub.f32 %v916_v44, %v954_v8  ;;  %v917_v31 = vmul.f32 0.015625, %v871_v30 }
 0x207   :  { %2578 = vmatmul.mubr.msk.bf16.gmra.mrb[60].mxu1 %vm577_vm2, %v1247_v59  ;;  %v682_v36 = vpop.xlane.xlu0 %681  ;;  %v1141_v57 = vmul.f32 %v2791_v46, %v1027_v58  ;;  %v1182_v53 = vmul.f32 %v3675_v0, %v1140_v40 }
 0x208   :  { %v1068_v43 = vadd.f32 1e-05, %v992_v28  ;;  %v993_v45 = vsub.f32 %v917_v31, %v955_v6  ;;  %v3951_v23 = vmul.f32 0.015625, %v682_v36  ;;  %2581 = vmatprep.mubr.msk.bf16.mxu1 %vm2916_vm0, %v4479_v9 }
 0x209   :  { %v685_v51 = vpop.xlane.xlu1 %684  ;;  %v1183_v35 = vmul.f32 %v3675_v0, %v1141_v57  ;;  %v1224_v60 = vadd.f32 %v3685_v11, %v1182_v53 }
 0x20a   :  { %2796 = vrsqrt.f32 %v1068_v43  ;;  %v1069_v63 = vadd.f32 1e-05, %v993_v45  ;;  %v956_v61 = vmul.f32 %v3951_v23, %v3951_v23  ;;  %v3960_v26 = vmul.f32 0.015625, %v685_v51 }
 0x20b   :  { %v874_v20 = vpop.xlane.xlu0 %873  ;;  %v1225_v49 = vadd.f32 %v3685_v11, %v1183_v35  ;;  %v1032_v14 = vsub.f32 %v3630_v50, %v3951_v23 }
 0x20c   :  { %v2793_v55 = vpop.eup %2792  ;;  %2798 = vrsqrt.f32 %v1069_v63  ;;  %v918_v16 = vmul.f32 0.015625, %v874_v20  ;;  %v957_v41 = vmul.f32 %v3960_v26, %v3960_v26  ;;  %v1033_v45 = vsub.f32 %v3633_v13, %v3960_v26 }
 0x20d   :  { %v877_v33 = vpop.xlane.xlu1 %876  ;;  %v1248_v37 = vpack.c.bf16 %v1225_v49, %v1224_v60  ;;  %v1142_v18 = vmul.f32 %v2793_v55, %v1028_v10 }
 0x20e   :  { %v2795_v4 = vpop.eup %2794  ;;  %v994_v2 = vsub.f32 %v918_v16, %v956_v61  ;;  %v919_v56 = vmul.f32 0.015625, %v877_v33 }
 0x20f   :  { %2582 = vmatmul.mubr.msk.bf16.gmra.mrb[64].mxu1 %vm577_vm2, %v1248_v37  ;;  %v688_v22 = vpop.xlane.xlu0 %687  ;;  %v1143_v29 = vmul.f32 %v2795_v4, %v1029_v25  ;;  %v1184_v3 = vmul.f32 %v3675_v0, %v1142_v18 }
 0x210   :  { %v1070_v34 = vadd.f32 1e-05, %v994_v2  ;;  %v995_v54 = vsub.f32 %v919_v56, %v957_v41  ;;  %v730_v39 = vmul.f32 0.015625, %v688_v22  ;;  %2585 = vmatprep.mubr.msk.bf16.mxu1 %vm2916_vm0, %v4479_v9 }
 0x211   :  { %v692_v21 = vpop.xlane.xlu1 %691  ;;  %v1185_v15 = vmul.f32 %v3675_v0, %v1143_v29  ;;  %v1226_v24 = vadd.f32 %v3685_v11, %v1184_v3 }
 0x212   :  { %2800 = vrsqrt.f32 %v1070_v34  ;;  %v1071_v47 = vadd.f32 1e-05, %v995_v54  ;;  %v958_v12 = vmul.f32 %v730_v39, %v730_v39  ;;  %v731_v52 = vmul.f32 0.015625, %v692_v21 }
 0x213   :  { %v880_v8 = vpop.xlane.xlu0 %879  ;;  %v1227_v42 = vadd.f32 %v3685_v11, %v1185_v15  ;;  %v1034_v23 = vsub.f32 %v3648_v48, %v730_v39 }
 0x214   :  { %v2797_v38 = vpop.eup %2796  ;;  %2802 = vrsqrt.f32 %v1071_v47  ;;  %v920_v27 = vmul.f32 0.015625, %v880_v8  ;;  %v959_v40 = vmul.f32 %v731_v52, %v731_v52  ;;  %v1035_v26 = vsub.f32 %v3651_v19, %v731_v52  ;;  %v4012_v19 = vld [vmem:[%s4470_s4] ss:$0 sm:$0xff] }
 0x215   :  { %v883_v44 = vpop.xlane.xlu1 %882  ;;  %v1249_v58 = vpack.c.bf16 %v1227_v42, %v1226_v24  ;;  %v1144_v30 = vmul.f32 %v2797_v38, %v1030_v7 }
 0x216   :  { %v2799_v59 = vpop.eup %2798  ;;  %v996_v46 = vsub.f32 %v920_v27, %v958_v12  ;;  %v921_v6 = vmul.f32 0.015625, %v883_v44 }
 0x217   :  { %2586 = vmatmul.mubr.msk.bf16.gmra.mrb[68].mxu1 %vm577_vm2, %v1249_v58  ;;  %v1145_v32 = vmul.f32 %v2799_v59, %v1031_v17  ;;  %v1186_v1 = vmul.f32 %v3675_v0, %v1144_v30 }
 0x218   :  { %v1072_v28 = vadd.f32 1e-05, %v996_v46  ;;  %v997_v31 = vsub.f32 %v921_v6, %v959_v40  ;;  %2589 = vmatprep.mubr.msk.bf16.mxu1 %vm2916_vm0, %v4479_v9 }
 0x219   :  { %v1187_v36 = vmul.f32 %v3675_v0, %v1145_v32  ;;  %v1228_v57 = vadd.f32 %v3685_v11, %v1186_v1 }
 0x21a   :  { %2804 = vrsqrt.f32 %v1072_v28  ;;  %v1073_v5 = vadd.f32 1e-05, %v997_v31 }
 0x21b   :  { %v1229_v53 = vadd.f32 %v3685_v11, %v1187_v36 }
 0x21c   :  { %v2801_v43 = vpop.eup %2800  ;;  %2806 = vrsqrt.f32 %v1073_v5 }
 0x21d   :  { %v1250_v51 = vpack.c.bf16 %v1229_v53, %v1228_v57  ;;  %v1146_v35 = vmul.f32 %v2801_v43, %v1032_v14 }
 0x21e   :  { %v2803_v63 = vpop.eup %2802 }
 0x21f   :  { %2590 = vmatmul.mubr.msk.bf16.gmra.mrb[72].mxu1 %vm577_vm2, %v1250_v51  ;;  %v1147_v61 = vmul.f32 %v2803_v63, %v1033_v45  ;;  %v1188_v10 = vmul.f32 %v3675_v0, %v1146_v35  ;;  %v4037_v45 = vld [vmem:[%s4471_s5] sm:$0x1] }
 0x220   :  { %2593 = vmatprep.mubr.msk.bf16.mxu1 %vm2916_vm0, %v4479_v9  ;;  %2409 = vmatprep.mubr.msk.bf16.mxu0 %vm577_vm2, %v4037_v45 }
 0x221   :  { %v1189_v50 = vmul.f32 %v3675_v0, %v1147_v61  ;;  %v1230_v20 = vadd.f32 %v3685_v11, %v1188_v10 }
 0x223   :  { %v1231_v60 = vadd.f32 %v3685_v11, %v1189_v50 }
 0x224   :  { %v2805_v13 = vpop.eup %2804 }
 0x225   :  { %v1251_v49 = vpack.c.bf16 %v1231_v60, %v1230_v20  ;;  %v1148_v55 = vmul.f32 %v2805_v13, %v1034_v23 }
 0x226   :  { %v2807_v16 = vpop.eup %2806 }
 0x227   :  { %2594 = vmatmul.mubr.msk.bf16.gmra.mrb[76].mxu1 %vm577_vm2, %v1251_v49  ;;  %v1149_v25 = vmul.f32 %v2807_v16, %v1035_v26  ;;  %v1190_v33 = vmul.f32 %v3675_v0, %v1148_v55 }
 0x228   :  { %2597 = vmatprep.mubr.msk.bf16.mxu1 %vm2916_vm0, %v4479_v9 }
 0x229   :  { %v1191_v48 = vmul.f32 %v3675_v0, %v1149_v25  ;;  %v1232_v37 = vadd.f32 %v3685_v11, %v1190_v33 }
 0x22b   :  { %v1233_v18 = vadd.f32 %v3685_v11, %v1191_v48 }
 0x22d   :  { %v1252_v4 = vpack.c.bf16 %v1233_v18, %v1232_v37 }
 0x22f   :  { %2598 = vmatmul.mubr.msk.bf16.gmra.mrb[80].mxu1 %vm577_vm2, %v1252_v4 }
 0x230   :  { %2607 = vmatprep.mubr.msk.bf16.mxu1 %vm2916_vm0, %v4479_v9 }
 0x272   :  { %v1385_v41 = vpop.f32.mrb[8].mxu1 }
 0x273   :  { %v1386_v2 = vadd.f32 %v4012_v19, %v1385_v41  ;;  %v2527_v56 = vpop.f32.mrb[9].mxu1 }
 0x274   :  { %v1388_v0 = vpop.f32.mrb[10].mxu1 }
 0x275   :  { %v1574_v22 = vmin.f32 %v1386_v2, 0.0  ;;  %v1389_v29 = vadd.f32 %v4012_v19, %v1388_v0  ;;  %v2528_v11 = vpop.f32.mrb[11].mxu1  ;;  %vm1536_vm14 = vcmp.gt.f32.partialorder %v1386_v2, 0.0 }
 0x277   :  { %v1612_v3 = vmul.f32 1.442695, %v1574_v22  ;;  %v1575_v34 = vmin.f32 %v1389_v29, 0.0  ;;  %vm1537_vm15 = vcmp.gt.f32.partialorder %v1389_v29, 0.0 }
 0x279   :  { %2808 = vpow2.f32 %v1612_v3  ;;  %v1614_v54 = vmul.f32 1.442695, %v1575_v34 }
 0x27a   :  { %v1393_v39 = vpop.f32.mrb[12].mxu1 }
 0x27b   :  { %2810 = vpow2.f32 %v1614_v54  ;;  %v1394_v21 = vadd.f32 %v4012_v19, %v1393_v39  ;;  %v2531_v15 = vpop.f32.mrb[13].mxu1 }
 0x27c   :  { %v1396_v47 = vpop.f32.mrb[14].mxu1 }
 0x27d   :  { %v1576_v12 = vmin.f32 %v1394_v21, 0.0  ;;  %v1397_v7 = vadd.f32 %v4012_v19, %v1396_v47  ;;  %v2532_v52 = vpop.f32.mrb[15].mxu1  ;;  %vm1538_vm1 = vcmp.gt.f32.partialorder %v1394_v21, 0.0 }
 0x27f   :  { %v1616_v8 = vmul.f32 1.442695, %v1576_v12  ;;  %v1577_v24 = vmin.f32 %v1397_v7, 0.0  ;;  %vm1539_vm3 = vcmp.gt.f32.partialorder %v1397_v7, 0.0 }
 0x281   :  { %2812 = vpow2.f32 %v1616_v8  ;;  %v1618_v42 = vmul.f32 1.442695, %v1577_v24 }
 0x282   :  { %v1401_v38 = vpop.f32.mrb[16].mxu1 }
 0x283   :  { %v2809_v27 = vpop.eup %2808  ;;  %2814 = vpow2.f32 %v1618_v42  ;;  %v1402_v17 = vadd.f32 %v4012_v19, %v1401_v38  ;;  %v2535_v44 = vpop.f32.mrb[17].mxu1 }
 0x284   :  { %v2307_v58 = vadd.f32 -1.0, %v2809_v27  ;;  %v1404_v30 = vpop.f32.mrb[18].mxu1 }
 0x285   :  { %v2811_v59 = vpop.eup %2810  ;;  %v1578_v40 = vmin.f32 %v1402_v17, 0.0  ;;  %v1405_v46 = vadd.f32 %v4012_v19, %v1404_v30  ;;  %v2536_v6 = vpop.f32.mrb[19].mxu1  ;;  %vm1540_vm4 = vcmp.gt.f32.partialorder %v1402_v17, 0.0 }
 0x286   :  { %v4020_v32 = vsel %vm1536_vm14, %v1386_v2, %v2307_v58  ;;  %v2308_v1 = vadd.f32 -1.0, %v2811_v59 }
 0x287   :  { %v1620_v28 = vmul.f32 1.442695, %v1578_v40  ;;  %v1579_v31 = vmin.f32 %v1405_v46, 0.0  ;;  %v4024_v36 = vmul.f32 %v4020_v32, %v4020_v32  ;;  %vm1541_vm5 = vcmp.gt.f32.partialorder %v1405_v46, 0.0 }
 0x288   :  { %v4026_v5 = vsel %vm1537_vm15, %v1389_v29, %v2308_v1 }
 0x289   :  { %v4030_v14 = vmul.f32 %v4026_v5, %v4026_v5  ;;  %2816 = vpow2.f32 %v1620_v28  ;;  %v1622_v57 = vmul.f32 1.442695, %v1579_v31  ;;  %v1764_v53 = vpack.c.bf16 %v4026_v5, %v4020_v32 }
 0x28a   :  { %v1409_v43 = vpop.f32.mrb[20].mxu1  ;;  %v2917_v32 = vmov 0  }
 0x28b   :  { %v2813_v51 = vpop.eup %2812  ;;  %2818 = vpow2.f32 %v1622_v57  ;;  %v1410_v35 = vadd.f32 %v4012_v19, %v1409_v43  ;;  %v2539_v63 = vpop.f32.mrb[21].mxu1  ;;  %2647 = vset.pattern.permute.xlu0 %v2917_v32 }
 0x28c   :  { %v2309_v10 = vadd.f32 -1.0, %v2813_v51  ;;  %v1412_v50 = vpop.f32.mrb[22].mxu1 }
 0x28d   :  { %v2815_v23 = vpop.eup %2814  ;;  %v1580_v20 = vmin.f32 %v1410_v35, 0.0  ;;  %v1413_v60 = vadd.f32 %v4012_v19, %v1412_v50  ;;  %v2540_v13 = vpop.f32.mrb[23].mxu1  ;;  %vm1542_vm6 = vcmp.gt.f32.partialorder %v1410_v35, 0.0 }
 0x28e   :  { %v4045_v26 = vsel %vm1538_vm1, %v1394_v21, %v2309_v10  ;;  %v2310_v49 = vadd.f32 -1.0, %v2815_v23 }
 0x28f   :  { %v1624_v55 = vmul.f32 1.442695, %v1580_v20  ;;  %v1581_v16 = vmin.f32 %v1413_v60, 0.0  ;;  %v4049_v25 = vmul.f32 %v4045_v26, %v4045_v26  ;;  %vm1543_vm7 = vcmp.gt.f32.partialorder %v1413_v60, 0.0 }
 0x290   :  { %v4051_v33 = vsel %vm1539_vm3, %v1397_v7, %v2310_v49 }
 0x291   :  { %v4055_v48 = vmul.f32 %v4051_v33, %v4051_v33  ;;  %2820 = vpow2.f32 %v1624_v55  ;;  %v1626_v37 = vmul.f32 1.442695, %v1581_v16  ;;  %v1765_v18 = vpack.c.bf16 %v4051_v33, %v4045_v26 }
 0x292   :  { %v1417_v4 = vpop.f32.mrb[24].mxu1 }
 0x293   :  { %v2817_v41 = vpop.eup %2816  ;;  %2822 = vpow2.f32 %v1626_v37  ;;  %v1418_v2 = vadd.f32 %v4012_v19, %v1417_v4  ;;  %v2543_v56 = vpop.f32.mrb[25].mxu1 }
 0x294   :  { %v2311_v22 = vadd.f32 -1.0, %v2817_v41  ;;  %v1420_v29 = vpop.f32.mrb[26].mxu1 }
 0x295   :  { %v2819_v11 = vpop.eup %2818  ;;  %v1582_v3 = vmin.f32 %v1418_v2, 0.0  ;;  %v1421_v34 = vadd.f32 %v4012_v19, %v1420_v29  ;;  %v2544_v54 = vpop.f32.mrb[27].mxu1  ;;  %vm1544_vm8 = vcmp.gt.f32.partialorder %v1418_v2, 0.0 }
 0x296   :  { %v4063_v39 = vsel %vm1540_vm4, %v1402_v17, %v2311_v22  ;;  %v2312_v21 = vadd.f32 -1.0, %v2819_v11 }
 0x297   :  { %v1628_v15 = vmul.f32 1.442695, %v1582_v3  ;;  %v1583_v47 = vmin.f32 %v1421_v34, 0.0  ;;  %v4067_v12 = vmul.f32 %v4063_v39, %v4063_v39  ;;  %vm1545_vm9 = vcmp.gt.f32.partialorder %v1421_v34, 0.0 }
 0x298   :  { %v4069_v7 = vsel %vm1541_vm5, %v1405_v46, %v2312_v21 }
 0x299   :  { %v4073_v52 = vmul.f32 %v4069_v7, %v4069_v7  ;;  %2824 = vpow2.f32 %v1628_v15  ;;  %v1630_v8 = vmul.f32 1.442695, %v1583_v47  ;;  %v1766_v24 = vpack.c.bf16 %v4069_v7, %v4063_v39 }
 0x29a   :  { %v1425_v42 = vpop.f32.mrb[28].mxu1 }
 0x29b   :  { %v2821_v38 = vpop.eup %2820  ;;  %2826 = vpow2.f32 %v1630_v8  ;;  %v1426_v27 = vadd.f32 %v4012_v19, %v1425_v42  ;;  %v2547_v17 = vpop.f32.mrb[29].mxu1 }
 0x29c   :  { %v2313_v58 = vadd.f32 -1.0, %v2821_v38  ;;  %v1428_v30 = vpop.f32.mrb[30].mxu1 }
 0x29d   :  { %v2823_v59 = vpop.eup %2822  ;;  %v1584_v40 = vmin.f32 %v1426_v27, 0.0  ;;  %v1429_v46 = vadd.f32 %v4012_v19, %v1428_v30  ;;  %v2548_v6 = vpop.f32.mrb[31].mxu1  ;;  %vm1546_vm10 = vcmp.gt.f32.partialorder %v1426_v27, 0.0 }
 0x29e   :  { %v4081_v1 = vsel %vm1542_vm6, %v1410_v35, %v2313_v58  ;;  %v2314_v28 = vadd.f32 -1.0, %v2823_v59 }
 0x29f   :  { %v1632_v31 = vmul.f32 1.442695, %v1584_v40  ;;  %v1585_v57 = vmin.f32 %v1429_v46, 0.0  ;;  %v4085_v43 = vmul.f32 %v4081_v1, %v4081_v1  ;;  %vm1547_vm11 = vcmp.gt.f32.partialorder %v1429_v46, 0.0 }
 0x2a0   :  { %v4087_v51 = vsel %vm1543_vm7, %v1413_v60, %v2314_v28 }
 0x2a1   :  { %v4091_v63 = vmul.f32 %v4087_v51, %v4087_v51  ;;  %2828 = vpow2.f32 %v1632_v31  ;;  %v1634_v10 = vmul.f32 1.442695, %v1585_v57  ;;  %v1767_v35 = vpack.c.bf16 %v4087_v51, %v4081_v1 }
 0x2a2   :  { %v1433_v50 = vpop.f32.mrb[32].mxu1 }
 0x2a3   :  { %v2825_v23 = vpop.eup %2824  ;;  %2830 = vpow2.f32 %v1634_v10  ;;  %v1434_v20 = vadd.f32 %v4012_v19, %v1433_v50  ;;  %v2551_v13 = vpop.f32.mrb[33].mxu1 }
 0x2a4   :  { %v2315_v60 = vadd.f32 -1.0, %v2825_v23  ;;  %v1436_v55 = vpop.f32.mrb[34].mxu1 }
 0x2a5   :  { %v2827_v16 = vpop.eup %2826  ;;  %v1586_v37 = vmin.f32 %v1434_v20, 0.0  ;;  %v1437_v4 = vadd.f32 %v4012_v19, %v1436_v55  ;;  %v2552_v41 = vpop.f32.mrb[35].mxu1  ;;  %vm1548_vm12 = vcmp.gt.f32.partialorder %v1434_v20, 0.0 }
 0x2a6   :  { %v4099_v56 = vsel %vm1544_vm8, %v1418_v2, %v2315_v60  ;;  %v2316_v22 = vadd.f32 -1.0, %v2827_v16 }
 0x2a7   :  { %v1636_v29 = vmul.f32 1.442695, %v1586_v37  ;;  %v1587_v11 = vmin.f32 %v1437_v4, 0.0  ;;  %v4103_v3 = vmul.f32 %v4099_v56, %v4099_v56  ;;  %vm1549_vm13 = vcmp.gt.f32.partialorder %v1437_v4, 0.0 }
 0x2a8   :  { %v4105_v54 = vsel %vm1545_vm9, %v1421_v34, %v2316_v22 }
 0x2a9   :  { %v4109_v21 = vmul.f32 %v4105_v54, %v4105_v54  ;;  %2832 = vpow2.f32 %v1636_v29  ;;  %v1638_v15 = vmul.f32 1.442695, %v1587_v11  ;;  %v1768_v2 = vpack.c.bf16 %v4105_v54, %v4099_v56 }
 0x2aa   :  { %v1441_v47 = vpop.f32.mrb[36].mxu1 }
 0x2ab   :  { %v2829_v8 = vpop.eup %2828  ;;  %2834 = vpow2.f32 %v1638_v15  ;;  %v1442_v42 = vadd.f32 %v4012_v19, %v1441_v47  ;;  %v2555_v38 = vpop.f32.mrb[37].mxu1 }
 0x2ac   :  { %v2317_v34 = vadd.f32 -1.0, %v2829_v8  ;;  %v1444_v58 = vpop.f32.mrb[38].mxu1 }
 0x2ad   :  { %v2831_v30 = vpop.eup %2830  ;;  %v1588_v59 = vmin.f32 %v1442_v42, 0.0  ;;  %v1445_v40 = vadd.f32 %v4012_v19, %v1444_v58  ;;  %v2556_v6 = vpop.f32.mrb[39].mxu1  ;;  %vm1550_vm14 = vcmp.gt.f32.partialorder %v1442_v42, 0.0 }
 0x2ae   :  { %v4117_v28 = vsel %vm1546_vm10, %v1426_v27, %v2317_v34  ;;  %v2318_v31 = vadd.f32 -1.0, %v2831_v30 }
 0x2af   :  { %v1640_v57 = vmul.f32 1.442695, %v1588_v59  ;;  %v1589_v10 = vmin.f32 %v1445_v40, 0.0  ;;  %v4121_v50 = vmul.f32 %v4117_v28, %v4117_v28  ;;  %vm1551_vm15 = vcmp.gt.f32.partialorder %v1445_v40, 0.0 }
 0x2b0   :  { %v4123_v23 = vsel %vm1547_vm11, %v1429_v46, %v2318_v31 }
 0x2b1   :  { %v4127_v13 = vmul.f32 %v4123_v23, %v4123_v23  ;;  %2836 = vpow2.f32 %v1640_v57  ;;  %v1642_v60 = vmul.f32 1.442695, %v1589_v10  ;;  %v1769_v27 = vpack.c.bf16 %v4123_v23, %v4117_v28 }
 0x2b2   :  { %v1449_v55 = vpop.f32.mrb[40].mxu1 }
 0x2b3   :  { %v2833_v16 = vpop.eup %2832  ;;  %2838 = vpow2.f32 %v1642_v60  ;;  %v1450_v37 = vadd.f32 %v4012_v19, %v1449_v55  ;;  %v2559_v41 = vpop.f32.mrb[41].mxu1 }
 0x2b4   :  { %v2319_v46 = vadd.f32 -1.0, %v2833_v16  ;;  %v1452_v29 = vpop.f32.mrb[42].mxu1 }
 0x2b5   :  { %v2835_v11 = vpop.eup %2834  ;;  %v1590_v15 = vmin.f32 %v1450_v37, 0.0  ;;  %v1453_v47 = vadd.f32 %v4012_v19, %v1452_v29  ;;  %v2560_v8 = vpop.f32.mrb[43].mxu1  ;;  %vm1552_vm1 = vcmp.gt.f32.partialorder %v1450_v37, 0.0 }
 0x2b6   :  { %v4135_v38 = vsel %vm1548_vm12, %v1434_v20, %v2319_v46  ;;  %v2320_v34 = vadd.f32 -1.0, %v2835_v11 }
 0x2b7   :  { %v1644_v58 = vmul.f32 1.442695, %v1590_v15  ;;  %v1591_v30 = vmin.f32 %v1453_v47, 0.0  ;;  %v4139_v59 = vmul.f32 %v4135_v38, %v4135_v38  ;;  %vm1553_vm3 = vcmp.gt.f32.partialorder %v1453_v47, 0.0 }
 0x2b8   :  { %v4141_v6 = vsel %vm1549_vm13, %v1437_v4, %v2320_v34 }
 0x2b9   :  { %v4145_v31 = vmul.f32 %v4141_v6, %v4141_v6  ;;  %2840 = vpow2.f32 %v1644_v58  ;;  %v1646_v57 = vmul.f32 1.442695, %v1591_v30  ;;  %v1770_v20 = vpack.c.bf16 %v4141_v6, %v4135_v38 }
 0x2ba   :  { %v1457_v10 = vpop.f32.mrb[44].mxu1 }
 0x2bb   :  { %v2837_v60 = vpop.eup %2836  ;;  %2842 = vpow2.f32 %v1646_v57  ;;  %v4150_v55 = vadd.f32 %v4012_v19, %v1457_v10  ;;  %v2563_v16 = vpop.f32.mrb[45].mxu1 }
 0x2bc   :  { %v2321_v41 = vadd.f32 -1.0, %v2837_v60  ;;  %v1460_v46 = vpop.f32.mrb[46].mxu1 }
 0x2bd   :  { %v2839_v29 = vpop.eup %2838  ;;  %v1592_v11 = vmin.f32 %v4150_v55, 0.0  ;;  %v4156_v15 = vadd.f32 %v4012_v19, %v1460_v46  ;;  %v2564_v8 = vpop.f32.mrb[47].mxu1  ;;  %vm1554_vm4 = vcmp.gt.f32.partialorder %v4150_v55, 0.0 }
 0x2be   :  { %v4158_v34 = vsel %vm1550_vm14, %v1442_v42, %v2321_v41  ;;  %v2322_v58 = vadd.f32 -1.0, %v2839_v29 }
 0x2bf   :  { %v1648_v30 = vmul.f32 1.442695, %v1592_v11  ;;  %v1593_v57 = vmin.f32 %v4156_v15, 0.0  ;;  %v4163_v10 = vmul.f32 %v4158_v34, %v4158_v34  ;;  %vm1555_vm5 = vcmp.gt.f32.partialorder %v4156_v15, 0.0 }
 0x2c0   :  { %v4165_v60 = vsel %vm1551_vm15, %v1445_v40, %v2322_v58 }
 0x2c1   :  { %v4169_v16 = vmul.f32 %v4165_v60, %v4165_v60  ;;  %2844 = vpow2.f32 %v1648_v30  ;;  %v1650_v46 = vmul.f32 1.442695, %v1593_v57 }
 0x2c2   :  { %v1465_v41 = vpop.f32.mrb[48].mxu1 }
 0x2c3   :  { %v2841_v29 = vpop.eup %2840  ;;  %2846 = vpow2.f32 %v1650_v46  ;;  %v4174_v11 = vadd.f32 %v4012_v19, %v1465_v41  ;;  %v2567_v8 = vpop.f32.mrb[49].mxu1 }
 0x2c4   :  { %v2323_v58 = vadd.f32 -1.0, %v2841_v29  ;;  %v1468_v4 = vpop.f32.mrb[50].mxu1 }
 0x2c5   :  { %v2843_v22 = vpop.eup %2842  ;;  %v1594_v30 = vmin.f32 %v4174_v11, 0.0  ;;  %v4180_v57 = vadd.f32 %v4012_v19, %v1468_v4  ;;  %v2568_v17 = vpop.f32.mrb[51].mxu1  ;;  %vm1556_vm6 = vcmp.gt.f32.partialorder %v4174_v11, 0.0 }
 0x2c6   :  { %v1742_v49 = vsel %vm1552_vm1, %v1450_v37, %v2323_v58  ;;  %v2324_v44 = vadd.f32 -1.0, %v2843_v22  ;;  %v1844_v17 = vsel %vm577_vm2, %v1764_v53, 0 }
 0x2c7   :  { %v1652_v46 = vmul.f32 1.442695, %v1594_v30  ;;  %v1595_v41 = vmin.f32 %v4180_v57, 0.0  ;;  %v4183_v8 = vmul.f32 %v1742_v49, %v1742_v49  ;;  %vm1557_vm7 = vcmp.gt.f32.partialorder %v4180_v57, 0.0 }
 0x2c8   :  { %v1743_v0 = vsel %vm1553_vm3, %v1453_v47, %v2324_v44  ;;  %v1263_v44 = vld [vmem:[%s4472_s6] sm:$0x1]  ;;  %s2920_s6 = smov [#allocation2]  }
 0x2c9   :  { %v1772_v40 = vpack.c.bf16 %v1743_v0, %v1742_v49  ;;  %v4185_v29 = vmul.f32 %v1743_v0, %v1743_v0  ;;  %2848 = vpow2.f32 %v1652_v46  ;;  %v1654_v61 = vmul.f32 1.442695, %v1595_v41  ;;  %2133 = vperm.xlu0 %2647, %v1263_v44   ;;  %s2216_s21 = sshll.u32 %s2920_s6, 4  ;;  %s2217_s21 = int_to_ptr.vmem [resolvable:$true] %s2216_s21 }
 0x2ca   :  { %v1473_v42 = vpop.f32.mrb[52].mxu1  ;;  %s2891_s22 = scalar_lea.vmem %s2217_s21, 48  ;;  %s2895_s23 = scalar_lea.vmem %s2217_s21, 64 }
 0x2cb   :  { %v2845_v37 = vpop.eup %2844  ;;  %2850 = vpow2.f32 %v1654_v61  ;;  %v4192_v22 = vadd.f32 %v4012_v19, %v1473_v42  ;;  %v2571_v4 = vpop.f32.mrb[53].mxu1  ;;  %2625 = vmatprep.subr.msk.bf16.mxu0 %vm577_vm2, %v1772_v40  ;;  %v2918_v40 = vmov 1   ;;  %p2892_p0 = scmp.ne.s32.totalorder %s2217_s21, %s2891_s22  ;;  %p2896_p1 = scmp.lt.s32.totalorder %s2217_s21, %s2217_s21 }
 0x2cc   :  { %v2325_v49 = vadd.f32 -1.0, %v2845_v37  ;;  %v1476_v47 = vpop.f32.mrb[54].mxu1  ;;  %2394 = vmatpush3.bf16.xpose.msra.mxu0 %v1844_v17  ;;  %2648 = vset.pattern.permute.xlu1 %v2918_v40  ;;  %p2897_p2 = scmp.lt.s32.totalorder %s2895_s23, %s2891_s22 }
 0x2cd   :  { %v2847_v5 = vpop.eup %2846  ;;  %v1596_v53 = vmin.f32 %v4192_v22, 0.0  ;;  %v4203_v61 = vadd.f32 %v4012_v19, %v1476_v47  ;;  %v2572_v42 = vpop.f32.mrb[55].mxu1  ;;  %2168 = vperm.xlu1 %2648, %v1263_v44   ;;  %2649 = vset.pattern.permute.xlu0 %v2918_v40  ;;  %vm1558_vm8 = vcmp.gt.f32.partialorder %v4192_v22, 0.0 }
 0x2ce   :  { %v1744_v58 = vsel %vm1554_vm4, %v4150_v55, %v2325_v49  ;;  %v2326_v30 = vadd.f32 -1.0, %v2847_v5  ;;  %p2898_p3 = por %p2897_p2, %p2896_p1 }
 0x2cf   :  { %v1656_v46 = vmul.f32 1.442695, %v1596_v53  ;;  %v1597_v41 = vmin.f32 %v4203_v61, 0.0  ;;  %v4208_v17 = vmul.f32 %v1744_v58, %v1744_v58  ;;  %vm1559_vm9 = vcmp.gt.f32.partialorder %v4203_v61, 0.0 }
 0x2d0   :  { %v1745_v37 = vsel %vm1555_vm5, %v4156_v15, %v2326_v30  ;;  %v1847_v15 = vsel %vm577_vm2, %v1765_v18, 0  ;;  %p2899_p4 = pnand %p2898_p3, %p2892_p0 }
 0x2d1   :  { %v1773_v4 = vpack.c.bf16 %v1745_v37, %v1744_v58  ;;  %v4211_v47 = vmul.f32 %v1745_v37, %v1745_v37  ;;  %2852 = vpow2.f32 %v1656_v46  ;;  %v1658_v32 = vmul.f32 1.442695, %v1597_v41 }
 0x2d2   :  { %v1481_v42 = vpop.f32.mrb[56].mxu1 }
 0x2d3   :  { %v2849_v0 = vpop.eup %2848  ;;  %2854 = vpow2.f32 %v1658_v32  ;;  %v4214_v55 = vadd.f32 %v4012_v19, %v1481_v42  ;;  %v2575_v44 = vpop.f32.mrb[57].mxu1  ;;  %2626 = vmatprep.subr.msk.bf16.mxu0 %vm577_vm2, %v1773_v4  ;;  %v1830_v49 = vpack.c.bf16 %v4211_v47, %v4208_v17  ;;  %v4483_v17 = vpack.c.bf16 %v4055_v48, %v4049_v25 }
 0x2d4   :  { %v2327_v5 = vadd.f32 -1.0, %v2849_v0  ;;  %v1484_v53 = vpop.f32.mrb[58].mxu1  ;;  %2396 = vmatpush3.bf16.xpose.msra.mxu0 %v1847_v15 }
 0x2d5   :  { %v2851_v40 = vpop.eup %2850  ;;  %v1598_v58 = vmin.f32 %v4214_v55, 0.0  ;;  %v4226_v30 = vadd.f32 %v4012_v19, %v1484_v53  ;;  %v2576_v46 = vpop.f32.mrb[59].mxu1  ;;  %v1850_v53 = vsel %vm577_vm2, %v1766_v24, 0  ;;  %vm1560_vm10 = vcmp.gt.f32.partialorder %v4214_v55, 0.0 }
 0x2d6   :  { %v1746_v41 = vsel %vm1556_vm6, %v4174_v11, %v2327_v5  ;;  %v2328_v26 = vadd.f32 -1.0, %v2851_v40  ;;  %v1985_v47 = vsel %vm577_vm2, %v4483_v17, 0 }
 0x2d7   :  { %v1660_v33 = vmul.f32 1.442695, %v1598_v58  ;;  %v1599_v18 = vmin.f32 %v4226_v30, 0.0  ;;  %v4231_v0 = vmul.f32 %v1746_v41, %v1746_v41  ;;  %vm1561_vm11 = vcmp.gt.f32.partialorder %v4226_v30, 0.0 }
 0x2d8   :  { %v1747_v37 = vsel %vm1557_vm7, %v4180_v57, %v2328_v26 }
 0x2d9   :  { %v1774_v4 = vpack.c.bf16 %v1747_v37, %v1746_v41  ;;  %v4234_v32 = vmul.f32 %v1747_v37, %v1747_v37  ;;  %2856 = vpow2.f32 %v1660_v33  ;;  %v1662_v42 = vmul.f32 1.442695, %v1599_v18 }
 0x2da   :  { %v1489_v44 = vpop.f32.mrb[60].mxu1 }
 0x2db   :  { %v2853_v15 = vpop.eup %2852  ;;  %2858 = vpow2.f32 %v1662_v42  ;;  %v4237_v11 = vadd.f32 %v4012_v19, %v1489_v44  ;;  %v2579_v5 = vpop.f32.mrb[61].mxu1  ;;  %2627 = vmatprep.subr.msk.bf16.mxu0 %vm577_vm2, %v1774_v4  ;;  %v1831_v57 = vpack.c.bf16 %v4234_v32, %v4231_v0  ;;  %v4485_v0 = vpack.c.bf16 %v4091_v63, %v4085_v43 }
 0x2dc   :  { %v2329_v40 = vadd.f32 -1.0, %v2853_v15  ;;  %v1492_v58 = vpop.f32.mrb[62].mxu1  ;;  %2398 = vmatpush3.bf16.xpose.msra.mxu0 %v1850_v53  ;;  %v4486_v32 = vpack.c.bf16 %v4109_v21, %v4103_v3  ;;  %v4488_v21 = vpack.c.bf16 %v4145_v31, %v4139_v59 }
 0x2dd   :  { %v2855_v46 = vpop.eup %2854  ;;  %v1600_v41 = vmin.f32 %v4237_v11, 0.0  ;;  %v4249_v26 = vadd.f32 %v4012_v19, %v1492_v58  ;;  %v2580_v33 = vpop.f32.mrb[63].mxu1  ;;  %v1853_v58 = vsel %vm577_vm2, %v1767_v35, 0  ;;  %vm1562_vm12 = vcmp.gt.f32.partialorder %v4237_v11, 0.0 }
 0x2de   :  { %v1748_v18 = vsel %vm1558_vm8, %v4192_v22, %v2329_v40  ;;  %v2330_v39 = vadd.f32 -1.0, %v2855_v46  ;;  %v1994_v43 = vsel %vm577_vm2, %v4486_v32, 0 }
 0x2df   :  { %v1664_v7 = vmul.f32 1.442695, %v1600_v41  ;;  %v1601_v24 = vmin.f32 %v4249_v26, 0.0  ;;  %v4254_v37 = vmul.f32 %v1748_v18, %v1748_v18  ;;  %vm1563_vm13 = vcmp.gt.f32.partialorder %v4249_v26, 0.0 }
 0x2e0   :  { %v1749_v4 = vsel %vm1559_vm9, %v4203_v61, %v2330_v39 }
 0x2e1   :  { %v1775_v42 = vpack.c.bf16 %v1749_v4, %v1748_v18  ;;  %v4257_v44 = vmul.f32 %v1749_v4, %v1749_v4  ;;  %2860 = vpow2.f32 %v1664_v7  ;;  %v1666_v15 = vmul.f32 1.442695, %v1601_v24 }
 0x2e2   :  { %v1497_v5 = vpop.f32.mrb[64].mxu1 }
 0x2e3   :  { %v2857_v53 = vpop.eup %2856  ;;  %2862 = vpow2.f32 %v1666_v15  ;;  %v4260_v22 = vadd.f32 %v4012_v19, %v1497_v5  ;;  %v2583_v40 = vpop.f32.mrb[65].mxu1  ;;  %2628 = vmatprep.subr.msk.bf16.mxu0 %vm577_vm2, %v1775_v42  ;;  %v1832_v61 = vpack.c.bf16 %v4257_v44, %v4254_v37  ;;  %v2000_v44 = vsel %vm577_vm2, %v4488_v21, 0 }
 0x2e4   :  { %v2331_v46 = vadd.f32 -1.0, %v2857_v53  ;;  %v1500_v41 = vpop.f32.mrb[66].mxu1  ;;  %2400 = vmatpush3.bf16.xpose.msra.mxu0 %v1853_v58  ;;  %v4491_v21 = vlaneseq }
 0x2e5   :  { %v2859_v33 = vpop.eup %2858  ;;  %v1602_v18 = vmin.f32 %v4260_v22, 0.0  ;;  %v4272_v39 = vadd.f32 %v4012_v19, %v1500_v41  ;;  %v2584_v7 = vpop.f32.mrb[67].mxu1  ;;  %v1856_v41 = vsel %vm577_vm2, %v1768_v2, 0  ;;  %vm1564_vm14 = vcmp.gt.f32.partialorder %v4260_v22, 0.0 }
 0x2e6   :  { %v1750_v24 = vsel %vm1560_vm10, %v4214_v55, %v2331_v46  ;;  %v2332_v1 = vadd.f32 -1.0, %v2859_v33 }
 0x2e7   :  { %v1668_v51 = vmul.f32 1.442695, %v1602_v18  ;;  %v1603_v35 = vmin.f32 %v4272_v39, 0.0  ;;  %v4277_v4 = vmul.f32 %v1750_v24, %v1750_v24  ;;  %vm1565_vm15 = vcmp.gt.f32.partialorder %v4272_v39, 0.0 }
 0x2e8   :  { %v1751_v42 = vsel %vm1561_vm11, %v4226_v30, %v2332_v1 }
 0x2e9   :  { %v1776_v15 = vpack.c.bf16 %v1751_v42, %v1750_v24  ;;  %v4280_v5 = vmul.f32 %v1751_v42, %v1751_v42  ;;  %2864 = vpow2.f32 %v1668_v51  ;;  %v1670_v53 = vmul.f32 1.442695, %v1603_v35 }
 0x2ea   :  { %v1505_v40 = vpop.f32.mrb[68].mxu1 }
 0x2eb   :  { %v2861_v58 = vpop.eup %2860  ;;  %2866 = vpow2.f32 %v1670_v53  ;;  %v4283_v55 = vadd.f32 %v4012_v19, %v1505_v40  ;;  %v2587_v46 = vpop.f32.mrb[69].mxu1  ;;  %2629 = vmatprep.subr.msk.bf16.mxu0 %vm577_vm2, %v1776_v15  ;;  %v1833_v30 = vpack.c.bf16 %v4280_v5, %v4277_v4 }
 0x2ec   :  { %v2333_v33 = vadd.f32 -1.0, %v2861_v58  ;;  %v1508_v18 = vpop.f32.mrb[70].mxu1  ;;  %2402 = vmatpush3.bf16.xpose.msra.mxu0 %v1856_v41 }
 0x2ed   :  { %v2863_v7 = vpop.eup %2862  ;;  %v1604_v24 = vmin.f32 %v4283_v55, 0.0  ;;  %v4295_v1 = vadd.f32 %v4012_v19, %v1508_v18  ;;  %v2588_v51 = vpop.f32.mrb[71].mxu1  ;;  %v1859_v18 = vsel %vm577_vm2, %v1769_v27, 0  ;;  %vm1566_vm1 = vcmp.gt.f32.partialorder %v4283_v55, 0.0 }
 0x2ee   :  { %v1752_v35 = vsel %vm1562_vm12, %v4237_v11, %v2333_v33  ;;  %v2334_v56 = vadd.f32 -1.0, %v2863_v7 }
 0x2ef   :  { %v1672_v54 = vmul.f32 1.442695, %v1604_v24  ;;  %v1605_v2 = vmin.f32 %v4295_v1, 0.0  ;;  %v4300_v42 = vmul.f32 %v1752_v35, %v1752_v35  ;;  %vm1567_vm3 = vcmp.gt.f32.partialorder %v4295_v1, 0.0 }
 0x2f0   :  { %v1753_v15 = vsel %vm1563_vm13, %v4249_v26, %v2334_v56 }
 0x2f1   :  { %v1777_v53 = vpack.c.bf16 %v1753_v15, %v1752_v35  ;;  %v4303_v40 = vmul.f32 %v1753_v15, %v1753_v15  ;;  %2868 = vpow2.f32 %v1672_v54  ;;  %v1674_v58 = vmul.f32 1.442695, %v1605_v2 }
 0x2f2   :  { %v1513_v46 = vpop.f32.mrb[72].mxu1 }
 0x2f3   :  { %v2865_v41 = vpop.eup %2864  ;;  %2870 = vpow2.f32 %v1674_v58  ;;  %v4306_v11 = vadd.f32 %v4012_v19, %v1513_v46  ;;  %v2591_v33 = vpop.f32.mrb[73].mxu1  ;;  %2630 = vmatprep.subr.msk.bf16.mxu0 %vm577_vm2, %v1777_v53  ;;  %v1834_v26 = vpack.c.bf16 %v4303_v40, %v4300_v42 }
 0x2f4   :  { %v2335_v7 = vadd.f32 -1.0, %v2865_v41  ;;  %v1516_v24 = vpop.f32.mrb[74].mxu1  ;;  %2404 = vmatpush3.bf16.xpose.msra.mxu0 %v1859_v18 }
 0x2f5   :  { %v2867_v51 = vpop.eup %2866  ;;  %v1606_v35 = vmin.f32 %v4306_v11, 0.0  ;;  %v4318_v56 = vadd.f32 %v4012_v19, %v1516_v24  ;;  %v2592_v54 = vpop.f32.mrb[75].mxu1  ;;  %v1862_v24 = vsel %vm577_vm2, %v1770_v20, 0  ;;  %vm1568_vm4 = vcmp.gt.f32.partialorder %v4306_v11, 0.0 }
 0x2f6   :  { %v1754_v2 = vsel %vm1564_vm14, %v4260_v22, %v2335_v7  ;;  %v2336_v28 = vadd.f32 -1.0, %v2867_v51 }
 0x2f7   :  { %v1676_v23 = vmul.f32 1.442695, %v1606_v35  ;;  %v1607_v27 = vmin.f32 %v4318_v56, 0.0  ;;  %v4323_v15 = vmul.f32 %v1754_v2, %v1754_v2  ;;  %vm1569_vm5 = vcmp.gt.f32.partialorder %v4318_v56, 0.0 }
 0x2f8   :  { %v1755_v53 = vsel %vm1565_vm15, %v4272_v39, %v2336_v28 }
 0x2f9   :  { %v1778_v58 = vpack.c.bf16 %v1755_v53, %v1754_v2  ;;  %v4326_v46 = vmul.f32 %v1755_v53, %v1755_v53  ;;  %2872 = vpow2.f32 %v1676_v23  ;;  %v1678_v41 = vmul.f32 1.442695, %v1607_v27 }
 0x2fa   :  { %v1521_v33 = vpop.f32.mrb[76].mxu1 }
 0x2fb   :  { %v2869_v18 = vpop.eup %2868  ;;  %2874 = vpow2.f32 %v1678_v41  ;;  %v4329_v22 = vadd.f32 %v4012_v19, %v1521_v33  ;;  %v2595_v7 = vpop.f32.mrb[77].mxu1  ;;  %2631 = vmatprep.subr.msk.bf16.mxu0 %vm577_vm2, %v1778_v58  ;;  %v1835_v39 = vpack.c.bf16 %v4326_v46, %v4323_v15 }
 0x2fc   :  { %v2337_v51 = vadd.f32 -1.0, %v2869_v18  ;;  %v1524_v35 = vpop.f32.mrb[78].mxu1  ;;  %2406 = vmatpush3.bf16.xpose.msra.mxu0 %v1862_v24 }
 0x2fd   :  { %v2871_v54 = vpop.eup %2870  ;;  %v1608_v2 = vmin.f32 %v4329_v22, 0.0  ;;  %v1525_v28 = vadd.f32 %v4012_v19, %v1524_v35  ;;  %v2596_v23 = vpop.f32.mrb[79].mxu1  ;;  %vm1570_vm6 = vcmp.gt.f32.partialorder %v4329_v22, 0.0 }
 0x2fe   :  { %v1756_v27 = vsel %vm1566_vm1, %v4283_v55, %v2337_v51  ;;  %v2338_v53 = vadd.f32 -1.0, %v2871_v54  ;;  %v4480_v51 = vpack.c.bf16 %v4165_v60, %v4158_v34 }
 0x2ff   :  { %v1680_v38 = vmul.f32 1.442695, %v1608_v2  ;;  %v1609_v6 = vmin.f32 %v1525_v28, 0.0  ;;  %v4343_v20 = vmul.f32 %v1756_v27, %v1756_v27  ;;  %vm1571_vm7 = vcmp.gt.f32.partialorder %v1525_v28, 0.0 }
 0x300   :  { %v1757_v58 = vsel %vm1567_vm3, %v4295_v1, %v2338_v53  ;;  %v1865_v54 = vsel %vm577_vm2, %v4480_v51, 0 }
 0x301   :  { %v1779_v41 = vpack.c.bf16 %v1757_v58, %v1756_v27  ;;  %v4346_v33 = vmul.f32 %v1757_v58, %v1757_v58  ;;  %2876 = vpow2.f32 %v1680_v38  ;;  %v1682_v18 = vmul.f32 1.442695, %v1609_v6 }
 0x302   :  { %v1529_v7 = vpop.f32.mrb[80].mxu1  ;;  %v4481_v58 = vpack.c.bf16 %v4185_v29, %v4183_v8  ;;  %v4482_v29 = vpack.c.bf16 %v4030_v14, %v4024_v36 }
 0x303   :  { %v2873_v24 = vpop.eup %2872  ;;  %2878 = vpow2.f32 %v1682_v18  ;;  %v1530_v35 = vadd.f32 %v4012_v19, %v1529_v7  ;;  %v2599_v55 = vpop.f32.mrb[81].mxu1  ;;  %2632 = vmatprep.subr.msk.bf16.mxu0 %vm577_vm2, %v1779_v41  ;;  %v1836_v1 = vpack.c.bf16 %v4346_v33, %v4343_v20 }
 0x304   :  { %v2339_v2 = vadd.f32 -1.0, %v2873_v24  ;;  %v1532_v23 = vpop.f32.mrb[82].mxu1  ;;  %2408 = vmatpush3.bf16.xpose.msra.mxu0 %v1865_v54 }
 0x305   :  { %v2875_v27 = vpop.eup %2874  ;;  %v1610_v53 = vmin.f32 %v1530_v35, 0.0  ;;  %v1533_v38 = vadd.f32 %v4012_v19, %v1532_v23  ;;  %v2600_v6 = vpop.f32.mrb[83].mxu1  ;;  %2633 = vmatprep.subr.msk.bf16.mxu0 %vm577_vm2, %v4481_v58  ;;  %vm1572_vm8 = vcmp.gt.f32.partialorder %v1530_v35, 0.0 }
 0x306   :  { %v1758_v34 = vsel %vm1568_vm4, %v4306_v11, %v2339_v2  ;;  %v2340_v60 = vadd.f32 -1.0, %v2875_v27  ;;  %v1982_v11 = vsel %vm577_vm2, %v4482_v29, 0 }
 0x307   :  { %v1684_v41 = vmul.f32 1.442695, %v1610_v53  ;;  %v1611_v18 = vmin.f32 %v1533_v38, 0.0  ;;  %v1815_v7 = vmul.f32 %v1758_v34, %v1758_v34  ;;  %vm1573_vm9 = vcmp.gt.f32.partialorder %v1533_v38, 0.0 }
 0x308   :  { %v1759_v24 = vsel %vm1569_vm5, %v4318_v56, %v2340_v60 }
 0x309   :  { %v1816_v55 = vmul.f32 %v1759_v24, %v1759_v24  ;;  %2880 = vpow2.f32 %v1684_v41  ;;  %v1686_v51 = vmul.f32 1.442695, %v1611_v18  ;;  %v1780_v19 = vpack.c.bf16 %v1759_v24, %v1758_v34 }
 0x30b   :  { %v2877_v54 = vpop.eup %2876  ;;  %2882 = vpow2.f32 %v1686_v51  ;;  %2410 = vmatmul.mubr.msk.bf16.vlgmr.msra.gmra.mrb[68].mxu0 %vm577_vm2, %v4037_v45  ;;  %v1892_v8 = vsel %vm577_vm2, %v1780_v19, 0  ;;  %v1837_v2 = vpack.c.bf16 %v1816_v55, %v1815_v7  ;;  %v4484_v51 = vpack.c.bf16 %v4073_v52, %v4067_v12 }
 0x30c   :  { %v2341_v23 = vadd.f32 -1.0, %v2877_v54  ;;  %2602 = vmatpush3.bf16.xpose.msra.mxu1 %v1892_v8  ;;  %2416 = vmatpush3.bf16.xpose.msra.mxu0 %v1982_v11  ;;  %v1991_v12 = vsel %vm577_vm2, %v4485_v0, 0 }
 0x30d   :  { %v2879_v56 = vpop.eup %2878  ;;  %2634 = vmatprep.subr.msk.bf16.mxu0 %vm577_vm2, %v1830_v49  ;;  %2603 = vmatprep.subr.bf16.mxu1 %v4479_v9  ;;  %v1988_v19 = vsel %vm577_vm2, %v4484_v51, 0  ;;  %v2030_v52 = vsel %vm577_vm2, %v1837_v2, 0 }
 0x30e   :  { %v1760_v27 = vsel %vm1570_vm6, %v4329_v22, %v2341_v23  ;;  %v2342_v53 = vadd.f32 -1.0, %v2879_v56  ;;  %2431 = vmatprep.mubr.msk.bf16.mxu0 %vm577_vm2, %v4037_v45 }
 0x30f   :  { %v1817_v14 = vmul.f32 %v1760_v27, %v1760_v27 }
 0x310   :  { %v1761_v36 = vsel %vm1571_vm7, %v1525_v28, %v2342_v53 }
 0x311   :  { %v1818_v6 = vmul.f32 %v1761_v36, %v1761_v36  ;;  %v1781_v58 = vpack.c.bf16 %v1761_v36, %v1760_v27 }
 0x313   :  { %v2881_v34 = vpop.eup %2880  ;;  %v1895_v60 = vsel %vm577_vm2, %v1781_v58, 0  ;;  %v1838_v49 = vpack.c.bf16 %v1818_v6, %v1817_v14 }
 0x314   :  { %v2343_v41 = vadd.f32 -1.0, %v2881_v34  ;;  %2604 = vmatpush3.bf16.xpose.msra.mxu1 %v1895_v60  ;;  %2418 = vmatpush3.bf16.xpose.msra.mxu0 %v1985_v47 }
 0x315   :  { %v2883_v22 = vpop.eup %2882  ;;  %2635 = vmatprep.subr.msk.bf16.mxu0 %vm577_vm2, %v1831_v57  ;;  %2605 = vmatprep.subr.bf16.mxu1 %v4479_v9  ;;  %v2033_v63 = vsel %vm577_vm2, %v1838_v49, 0  ;;  %v4487_v57 = vpack.c.bf16 %v4127_v13, %v4121_v50 }
 0x316   :  { %v1762_v28 = vsel %vm1572_vm8, %v1530_v35, %v2343_v41  ;;  %v2344_v18 = vadd.f32 -1.0, %v2883_v22  ;;  %v2919_v22 = vmov 1966171168  }
 0x317   :  { %v1819_v25 = vmul.f32 %v1762_v28, %v1762_v28  ;;  %v1997_v37 = vsel %vm577_vm2, %v4487_v57, 0 }
 0x318   :  { %v1763_v7 = vsel %vm1573_vm9, %v1533_v38, %v2344_v18 }
 0x319   :  { %v1820_v48 = vmul.f32 %v1763_v7, %v1763_v7  ;;  %v1782_v24 = vpack.c.bf16 %v1763_v7, %v1762_v28  ;;  %v2183_v28 = vunpack.c.l.s4 %v2919_v22 }
 0x31b   :  { %v1898_v55 = vsel %vm577_vm2, %v1782_v24, 0  ;;  %v1839_v54 = vpack.c.bf16 %v1820_v48, %v1819_v25  ;;  %v2184_v24 = vunpack.c.0.s8 %v2183_v28 }
 0x31c   :  { %2606 = vmatpush3.bf16.xpose.msra.mxu1 %v1898_v55  ;;  %2420 = vmatpush3.bf16.xpose.msra.mxu0 %v1988_v19 }
 0x31d   :  { %2636 = vmatprep.subr.msk.bf16.mxu0 %vm577_vm2, %v1832_v61  ;;  %2611 = vmatprep.subr.bf16.mxu1 %v4479_v9  ;;  %v2036_v3 = vsel %vm577_vm2, %v1839_v54, 0 }
 0x323   :  { %2608 = vmatmul.mubr.msk.bf16.vlgmr.msra.gmra.mrb[84].mxu1 %vm577_vm2, %v4037_v45 }
 0x324   :  { %2422 = vmatpush3.bf16.xpose.msra.mxu0 %v1991_v12  ;;  %2612 = vmatpush3.bf16.xpose.msra.mxu1 %v2030_v52  ;;  %v4490_v12 = vld [vmem:[#allocation5_spill] sm:$0xff] }
 0x325   :  { %2637 = vmatprep.subr.msk.bf16.mxu0 %vm577_vm2, %v1833_v30  ;;  %2613 = vmatprep.subr.bf16.mxu1 %v4479_v9  ;;  %v2187_v52 = vsub.s32 %v2184_v24, %v4490_v12 }
 0x326   :  { %2617 = vmatprep.mubr.msk.bf16.mxu1 %vm2916_vm0, %v4479_v9  ;;  %vm2207_vm0 = vcmp.lt.s32.totalorder %v4491_v21, 300 }
 0x32c   :  { %2424 = vmatpush3.bf16.xpose.msra.mxu0 %v1994_v43  ;;  %2614 = vmatpush3.bf16.xpose.msra.mxu1 %v2033_v63 }
 0x32d   :  { %2638 = vmatprep.subr.msk.bf16.mxu0 %vm577_vm2, %v1834_v26  ;;  %2615 = vmatprep.subr.bf16.mxu1 %v4479_v9  ;;  %v4489_v9 = vpack.c.bf16 %v4169_v16, %v4163_v10 }
 0x32f   :  { %v2003_v50 = vsel %vm577_vm2, %v4489_v9, 0 }
 0x334   :  { %2426 = vmatpush3.bf16.xpose.msra.mxu0 %v1997_v37  ;;  %2616 = vmatpush3.bf16.xpose.msra.mxu1 %v2036_v3 }
 0x335   :  { %2639 = vmatprep.subr.msk.bf16.mxu0 %vm577_vm2, %v1835_v39 }
 0x33b   :  { %2618 = vmatmul.mubr.msk.bf16.vlgmr.msra.gmra.mrb[88].mxu1 %vm577_vm2, %v4037_v45 }
 0x33c   :  { %2428 = vmatpush3.bf16.xpose.msra.mxu0 %v2000_v44 }
 0x33d   :  { %2640 = vmatprep.subr.msk.bf16.mxu0 %vm577_vm2, %v1836_v1 }
 0x344   :  { %2430 = vmatpush3.bf16.xpose.msra.mxu0 %v2003_v50 }
 0x348   :  { %v2134_v40 = vpop.permute.xlu0 %2133 }
 0x349   :  { %v2139_v46 = vrot.slane %v2134_v40, %v3149_v62 }
 0x34b   :  { %2432 = vmatmul.mubr.msk.bf16.vlgmr.msra.gmra.mrb[72].mxu0 %vm577_vm2, %v4037_v45 }
 0x34c   :  { %v2169_v18 = vpop.permute.xlu1 %2168 }
 0x34d   :  { %v2174_v55 = vrot.slane %v2169_v18, %v3149_v62 }
 0x3de   :  { %v1934_v13 = vpop.f32.mrb[68].mxu0 }
 0x3df   :  { %v1936_v59 = vpop.f32.mrb[69].mxu0  ;;  %v2119_v29 = vmul.f32 %v1934_v13, %v1934_v13  ;;  %v2140_v36 = vmul.f32 %v2139_v46, %v1934_v13 }
 0x3e0   :  { %v1938_v31 = vpop.f32.mrb[70].mxu0  ;;  %v2120_v2 = vmul.f32 %v1936_v59, %v1936_v59  ;;  %v2141_v58 = vmul.f32 %v2139_v46, %v1936_v59 }
 0x3e1   :  { %v1939_v61 = vpop.f32.mrb[71].mxu0  ;;  %v2146_v17 = vrot.slane %v2140_v36, 7 }
 0x3e2   :  { %v2147_v47 = vrot.slane %v2141_v58, 7 }
 0x3e3   :  { %v2152_v49 = vsub.f32 %v1934_v13, %v2146_v17 }
 0x3e4   :  { %v2153_v41 = vsub.f32 %v1936_v59, %v2147_v47 }
 0x3e5   :  { %v2158_v7 = vrot.slane %v2152_v49, 1 }
 0x3e6   :  { %v2159_v48 = vrot.slane %v2153_v41, 1 }
 0x3f6   :  { %v1975_v4 = vpop.f32.mrb[84].mxu1 }
 0x3f7   :  { %v2609_v5 = vpop.f32.mrb[85].mxu1  ;;  %v2121_v26 = vmul.f32 %v1975_v4, %v1975_v4  ;;  %v2142_v39 = vmul.f32 %v2139_v46, %v1975_v4 }
 0x3f8   :  { %v1978_v30 = vpop.f32.mrb[86].mxu1 }
 0x3f9   :  { %v2610_v42 = vpop.f32.mrb[87].mxu1  ;;  %v2148_v45 = vrot.slane %v2142_v39, 7 }
 0x3fb   :  { %v2154_v1 = vsub.f32 %v1975_v4, %v2148_v45 }
 0x3fd   :  { %v2160_v38 = vrot.slane %v2154_v1, 1 }
 0x40e   :  { %v2113_v15 = vpop.f32.mrb[88].mxu1 }
 0x40f   :  { %v2124_v10 = vsub.f32 %v2113_v15, %v2121_v26  ;;  %v2619_v16 = vpop.f32.mrb[89].mxu1 }
 0x410   :  { %v2116_v20 = vpop.f32.mrb[90].mxu1 }
 0x411   :  { %v2127_v33 = vadd.f32 1e-05, %v2124_v10  ;;  %v2620_v35 = vpop.f32.mrb[91].mxu1 }
 0x413   :  { %2884 = vrsqrt.f32 %v2127_v33 }
 0x41d   :  { %v2885_v8 = vpop.eup %2884 }
 0x41e   :  { %v2072_v11 = vpop.f32.mrb[72].mxu0  ;;  %v2166_v23 = vmul.f32 %v2885_v8, %v2160_v38 }
 0x41f   :  { %v2122_v56 = vsub.f32 %v2072_v11, %v2119_v29  ;;  %v2074_v27 = vpop.f32.mrb[73].mxu0 }
 0x420   :  { %v2123_v53 = vsub.f32 %v2074_v27, %v2120_v2  ;;  %v2076_v14 = vpop.f32.mrb[74].mxu0  ;;  %v2177_v43 = vadd.f32 %v2174_v55, %v2166_v23 }
 0x421   :  { %v2125_v6 = vadd.f32 1e-05, %v2122_v56  ;;  %v2077_v34 = vpop.f32.mrb[75].mxu0 }
 0x422   :  { %v2126_v60 = vadd.f32 1e-05, %v2123_v53  ;;  %v2195_v57 = vrot.slane %v2177_v43, %v2187_v52 }
 0x423   :  { %2886 = vrsqrt.f32 %v2125_v6 }
 0x424   :  { %2888 = vrsqrt.f32 %v2126_v60 }
 0x42d   :  { %v2887_v25 = vpop.eup %2886 }
 0x42e   :  { %v2889_v51 = vpop.eup %2888  ;;  %v2164_v19 = vmul.f32 %v2887_v25, %v2158_v7 }
 0x42f   :  { %v2165_v54 = vmul.f32 %v2889_v51, %v2159_v48 }
 0x430   :  { %v2175_v0 = vadd.f32 %v2174_v55, %v2164_v19 }
 0x431   :  { %v2176_v32 = vadd.f32 %v2174_v55, %v2165_v54 }
 0x433   :  { %v2181_v63 = vcombine.low %v2175_v0, %v2176_v32 }
 0x435   :  { %v2188_v37 = vrot.slane %v2181_v63, %v2187_v52 }
 0x437   :  { %v2196_v3 = vcombine.low %v2188_v37, %v2195_v57 }
 0x439   :  { %v2203_v44 = vrot.slane %v2196_v3, %v2187_v52 }
 0x43b   :  { %2209 = vst.msk [vmem:[#allocation2] sm:$0x7] %vm2207_vm0, %v2203_v44 }
 0x43c   :  { %2902 = shalt.err (!%p2899_p4)
}
 0x43d   :  { %s2903_s26 = scalar_lea.hbm %s4473_s7, 48 }
 0x43e   :  { %p2904_p5 = scmp.ne.s32.totalorder %s4473_s7, %s2903_s26  ;;  %p2907_p6 = scmp.lt.u32.totalorder %s2903_s26, %s4473_s7 }
 0x440   :  { %p2909_p7 = pnand %p2907_p6, %p2904_p5 }
 0x442   :  { %2912 = shalt.err (!%p2909_p7)
}
 0x443   :  { %2219 = dma.vmem_to_hbm [thread:$0]  %s2217_s21, 48, %s4473_s7, [#allocation3]  }
 0x444   :  { %2913 = dma.done.wait [#allocation3], 48  }
 0x445   :  { %2914 = vsyncadd [#allocation3], 4294967248 }
 0x446   :  { %2223 = vsyncpa [#allocation3], 1 }

</bundles_post_ra>
